<compile_context>
chip_gen: v6e
topology: v6e:2x2x1
jax: 0.10.0
libtpu: 0.0.40
codegen_flags: <defaults>
</compile_context>

<pallas_src>
import functools

import jax
import jax.numpy as jnp
import numpy as np
from jax.experimental import pallas as pl
from jax.experimental.pallas import tpu as pltpu


# ----------------------------------------------------------------------------
# BlockSpec helper: tiny problem => whole-array blocks, single grid step
# ----------------------------------------------------------------------------
def _full_spec(shape):
    return pl.BlockSpec(tuple(shape), lambda *_: (0,) * len(shape))


# ----------------------------------------------------------------------------
# Fused forward kernel (decode is a Python-static flag baked in at trace time)
# ----------------------------------------------------------------------------
def _fused_forward_kernel(
    # ---- inputs -------------------------------------------------------------
    motion_ref,               # (B, S, F)  motion frames
    tok_ref,                  # (B, T, D)  sbert token embeddings
    tmask_ref,                # (B, T)     sbert attention mask (0/1 float)
    clip_ref,                 # (B, C)     clip / pooler text embedding
    len_ref,                  # (B, 1)     motion lengths (int32)
    proj_w_ref, proj_b_ref,   # text projector      (C, L), (1, L)
    menc_w_ref, menc_b_ref,   # motion-encoder head (F, L), (1, L)
    dec_w_ref, dec_b_ref,     # decoder head        (L, F), (1, F)
    # ---- outputs ------------------------------------------------------------
    t_emb_ref,                # (B, L)
    m_emb_ref,                # (B, L)
    sim_ref,                  # (B, B)
    *recon_refs,              # (B, S, F) x2 when decode=True, else empty
    decode: bool,
):
    B, S, F = motion_ref.shape

    # ---- motion length mask, built in-register:  mask[i, l:] = 0 ------------
    frame_idx = jax.lax.broadcasted_iota(jnp.int32, (B, S), 1)
    m_mask = (frame_idx < len_ref[...]).astype(jnp.float32)              # (B, S)

    # ---- motion encoder stand-in: masked mean pool over frames -> linear ----
    # TODO(synk): real motion_encoder is a pretrained transformer VAE
    # (checkpointed); this is a deterministic masked-pool + linear stand-in
    # for its .loc[:, 0] head.
    pooled_sum = jnp.sum(motion_ref[...] * m_mask[:, :, None], axis=1)   # (B, F)
    frame_cnt = jnp.maximum(jnp.sum(m_mask, axis=1, keepdims=True), 1e-9)
    pooled = pooled_sum * pl.reciprocal(frame_cnt)                       # exact
    m_emb = (jnp.dot(pooled, menc_w_ref[...],
                     preferred_element_type=jnp.float32) + menc_b_ref[...])
    m_emb_ref[...] = m_emb

    # ---- trainables['text'] (TextProjectorV1): linear on clip pooler emb ----
    t_emb = (jnp.dot(clip_ref[...], proj_w_ref[...],
                     preferred_element_type=jnp.float32) + proj_b_ref[...])
    t_emb_ref[...] = t_emb

    # ---- calc_text_similarity: masked mean pool -> L2 norm -> cosine sim ----
    tmask = tmask_ref[...]                                               # (B, T)
    tok_sum = jnp.sum(tok_ref[...] * tmask[:, :, None], axis=1)          # (B, D)
    tok_cnt = jnp.maximum(jnp.sum(tmask, axis=1, keepdims=True), 1e-9)   # (B, 1)
    sent = tok_sum * pl.reciprocal(tok_cnt)                              # (B, D)
    # F.normalize(p=2, dim=1, eps=1e-12)    (rsqrt -> EUP slot)
    u = sent * jax.lax.rsqrt(
        jnp.maximum(jnp.sum(sent * sent, axis=1, keepdims=True), 1e-24))
    # F.cosine_similarity(eps=1e-8): fold the per-row 1/max(||u||,1e-8) into
    # the rows *before* a single (B,D)x(D,B) MXU matmul — no K=1 ww matmul.
    v = u * jax.lax.rsqrt(
        jnp.maximum(jnp.sum(u * u, axis=1, keepdims=True), 1e-16))
    sim_ref[...] = jax.lax.dot_general(
        v, v, (((1,), (1,)), ((), ())), preferred_element_type=jnp.float32)

    # ---- decoder stand-in: latent -> per-frame features, masked by length ---
    # TODO(synk): real motion_decoder is a pretrained transformer VAE decoder;
    # deterministic linear stand-in.  Only traced when decode=True, so the
    # decode=False variant skips both the compute and the (B,S,F) writebacks.
    if decode:
        t_recon_ref, m_recon_ref = recon_refs
        dec_w = dec_w_ref[...]
        dec_b = dec_b_ref[...]
        mask3 = m_mask[:, :, None]                                       # (B, S, 1)
        t_frame = jnp.dot(t_emb, dec_w, preferred_element_type=jnp.float32) + dec_b
        m_frame = jnp.dot(m_emb, dec_w, preferred_element_type=jnp.float32) + dec_b
        t_recon_ref[...] = t_frame[:, None, :] * mask3
        m_recon_ref[...] = m_frame[:, None, :] * mask3


# ----------------------------------------------------------------------------
# Python wrapper (glue only — one pallas_call for the whole forward)
# ----------------------------------------------------------------------------
def text2motion_alignment_forward(params, motion, sbert_tok_emb, sbert_attn_mask,
                                  clip_emb, lengths, decode=True):
    """JAX/Pallas equivalent of Text2MotionAlignmentV1.forward.

    TODO(synk): text_encoder / sbert are frozen pretrained transformers; their
    outputs (clip_emb, sbert_tok_emb, sbert_attn_mask) are taken as inputs.
    """
    B, S, F = motion.shape
    L = params["proj_w"].shape[1]

    inputs = (
        motion.astype(jnp.float32),
        sbert_tok_emb.astype(jnp.float32),
        sbert_attn_mask.astype(jnp.float32),          # 2-D mask, NOT expanded
        clip_emb.astype(jnp.float32),
        lengths.astype(jnp.int32).reshape(B, 1),      # mask built in-kernel
        params["proj_w"], params["proj_b"],
        params["menc_w"], params["menc_b"],
        params["dec_w"], params["dec_b"],
    )
    out_shape = [
        jax.ShapeDtypeStruct((B, L), jnp.float32),    # t_emb
        jax.ShapeDtypeStruct((B, L), jnp.float32),    # m_emb
        jax.ShapeDtypeStruct((B, B), jnp.float32),    # t_similarity
    ]
    if decode:
        out_shape += [
            jax.ShapeDtypeStruct((B, S, F), jnp.float32),  # t_recon
            jax.ShapeDtypeStruct((B, S, F), jnp.float32),  # m_recon
        ]

    results = pl.pallas_call(
        functools.partial(_fused_forward_kernel, decode=decode),
        out_shape=tuple(out_shape),
        grid=(1,),
        in_specs=[_full_spec(x.shape) for x in inputs],
        out_specs=tuple(_full_spec(o.shape) for o in out_shape),
        compiler_params=pltpu.CompilerParams(dimension_semantics=("arbitrary",)),
    )(*inputs)

    t_emb, m_emb, sim = results[0], results[1], results[2]
    output = {"m_emb": m_emb, "t_emb": t_emb,
              "clip_emb": clip_emb, "t_similarity": sim}
    if decode:
        output["t_recon"] = results[3]
        output["m_recon"] = results[4]
    return output


# ----------------------------------------------------------------------------
# Pure-JAX reference of the whole forward (correctness check)
# ----------------------------------------------------------------------------
def ref_forward(params, motion, tok, tmask, clip_emb, lengths, decode=True):
    B, S, F = motion.shape
    m_mask = (jnp.arange(S)[None, :] < lengths[:, None]).astype(jnp.float32)
    pooled = jnp.sum(motion * m_mask[:, :, None], axis=1) / jnp.maximum(
        jnp.sum(m_mask, axis=1, keepdims=True), 1e-9)
    m_emb = pooled @ params["menc_w"] + params["menc_b"]
    t_emb = clip_emb @ params["proj_w"] + params["proj_b"]

    tmask = tmask.astype(jnp.float32)
    sent = jnp.sum(tok * tmask[:, :, None], axis=1) / jnp.maximum(
        jnp.sum(tmask, axis=1, keepdims=True), 1e-9)
    sent = sent / jnp.maximum(
        jnp.sqrt(jnp.sum(sent * sent, axis=1, keepdims=True)), 1e-12)
    w = jnp.sum(sent * sent, axis=1)
    sim = (sent @ sent.T) / jnp.sqrt(jnp.maximum(w[:, None] * w[None, :], 1e-16))

    out = {"m_emb": m_emb, "t_emb": t_emb, "clip_emb": clip_emb,
           "t_similarity": sim}
    if decode:
        out["t_recon"] = (t_emb @ params["dec_w"] + params["dec_b"])[:, None, :] * m_mask[:, :, None]
        out["m_recon"] = (m_emb @ params["dec_w"] + params["dec_b"])[:, None, :] * m_mask[:, :, None]
    return out


if __name__ == "__main__":
    # high-precision matmuls in the pure-JAX reference (kernel dots are f32)
    jax.config.update("jax_default_matmul_precision", "highest")

    key = jax.random.PRNGKey(0)
    ks = jax.random.split(key, 10)

    # small shapes consistent with the forward pass
    B, S, NFEATS = 4, 16, 8          # motion: (B, S, F)
    T, D_SBERT = 8, 32               # sbert token embeddings
    CLIP_DIM, LATENT = 32, 32        # text encoder pooler / alignment latent

    motion = jax.random.normal(ks[0], (B, S, NFEATS), jnp.float32)
    sbert_tok_emb = jax.random.normal(ks[1], (B, T, D_SBERT), jnp.float32)
    clip_emb = jax.random.normal(ks[2], (B, CLIP_DIM), jnp.float32)
    lengths = jnp.array([16, 12, 8, 5], jnp.int32)
    sbert_lens = jnp.array([8, 6, 4, 7], jnp.int32)
    sbert_attn_mask = (jnp.arange(T)[None, :] < sbert_lens[:, None]).astype(jnp.float32)

    # deterministic parameter init (text projector, motion-encoder head,
    # decoder head stand-ins)
    params = {
        "proj_w": 0.05 * jax.random.normal(ks[3], (CLIP_DIM, LATENT), jnp.float32),
        "proj_b": 0.01 * jax.random.normal(ks[4], (1, LATENT), jnp.float32),
        "menc_w": 0.05 * jax.random.normal(ks[5], (NFEATS, LATENT), jnp.float32),
        "menc_b": 0.01 * jax.random.normal(ks[6], (1, LATENT), jnp.float32),
        "dec_w": 0.05 * jax.random.normal(ks[7], (LATENT, NFEATS), jnp.float32),
        "dec_b": 0.01 * jax.random.normal(ks[8], (1, NFEATS), jnp.float32),
    }

    # ---- decode=True path (full forward) ------------------------------------
    out = text2motion_alignment_forward(
        params, motion, sbert_tok_emb, sbert_attn_mask, clip_emb, lengths,
        decode=True)
    out = jax.block_until_ready(out)

    ref = ref_forward(params, motion, sbert_tok_emb, sbert_attn_mask,
                      clip_emb, lengths, decode=True)

    assert out["m_emb"].shape == (B, LATENT)
    assert out["t_emb"].shape == (B, LATENT)
    assert out["t_similarity"].shape == (B, B)
    assert out["t_recon"].shape == (B, S, NFEATS)
    assert out["m_recon"].shape == (B, S, NFEATS)
    for name in ("t_emb", "m_emb", "t_similarity", "t_recon", "m_recon"):
        np.testing.assert_allclose(
            np.asarray(out[name]), np.asarray(ref[name]),
            rtol=1e-5, atol=1e-5, err_msg=name)

    # ---- decode=False path (reduced kernel: no recon compute / writeback) ---
    out_nd = text2motion_alignment_forward(
        params, motion, sbert_tok_emb, sbert_attn_mask, clip_emb, lengths,
        decode=False)
    out_nd = jax.block_until_ready(out_nd)
    assert "t_recon" not in out_nd and "m_recon" not in out_nd
    for name in ("t_emb", "m_emb", "t_similarity"):
        np.testing.assert_allclose(
            np.asarray(out_nd[name]), np.asarray(ref[name]),
            rtol=1e-5, atol=1e-5, err_msg=name + " (decode=False)")

    print("KERNEL_OK")
</pallas_src>

<mosaic_0001>
module attributes {stable_mosaic.version = 11 : i64} {
  func.func @_fused_forward_kernel(%arg0: i32, %arg1: memref<4x16x8xf32, #tpu.memory_space<vmem>>, %arg2: memref<4x8x32xf32, #tpu.memory_space<vmem>>, %arg3: memref<4x8xf32, #tpu.memory_space<vmem>>, %arg4: memref<4x32xf32, #tpu.memory_space<vmem>>, %arg5: memref<4x1xi32, #tpu.memory_space<vmem>>, %arg6: memref<32x32xf32, #tpu.memory_space<vmem>>, %arg7: memref<1x32xf32, #tpu.memory_space<vmem>>, %arg8: memref<8x32xf32, #tpu.memory_space<vmem>>, %arg9: memref<1x32xf32, #tpu.memory_space<vmem>>, %arg10: memref<32x8xf32, #tpu.memory_space<vmem>>, %arg11: memref<1x8xf32, #tpu.memory_space<vmem>>, %arg12: memref<4x32xf32, #tpu.memory_space<vmem>>, %arg13: memref<4x32xf32, #tpu.memory_space<vmem>>, %arg14: memref<4x4xf32, #tpu.memory_space<vmem>>, %arg15: memref<4x16x8xf32, #tpu.memory_space<vmem>>, %arg16: memref<4x16x8xf32, #tpu.memory_space<vmem>>) attributes {dimension_semantics = [#tpu.dimension_semantics<arbitrary>], iteration_bounds = array<i64: 1>, scalar_prefetch = 0 : i64, scratch_operands = 0 : i64, tpu.core_type = #tpu.core_type<tc>, window_params = [{pipeline_mode = #tpu.pipeline_mode<synchronous>, transform_indices = @transform_0, window_bounds = array<i64: 4, 16, 8>}, {pipeline_mode = #tpu.pipeline_mode<synchronous>, transform_indices = @transform_1, window_bounds = array<i64: 4, 8, 32>}, {pipeline_mode = #tpu.pipeline_mode<synchronous>, transform_indices = @transform_2, window_bounds = array<i64: 4, 8>}, {pipeline_mode = #tpu.pipeline_mode<synchronous>, transform_indices = @transform_3, window_bounds = array<i64: 4, 32>}, {pipeline_mode = #tpu.pipeline_mode<synchronous>, transform_indices = @transform_4, window_bounds = array<i64: 4, 1>}, {pipeline_mode = #tpu.pipeline_mode<synchronous>, transform_indices = @transform_5, window_bounds = array<i64: 32, 32>}, {pipeline_mode = #tpu.pipeline_mode<synchronous>, transform_indices = @transform_6, window_bounds = array<i64: 1, 32>}, {pipeline_mode = #tpu.pipeline_mode<synchronous>, transform_indices = @transform_7, window_bounds = array<i64: 8, 32>}, {pipeline_mode = #tpu.pipeline_mode<synchronous>, transform_indices = @transform_8, window_bounds = array<i64: 1, 32>}, {pipeline_mode = #tpu.pipeline_mode<synchronous>, transform_indices = @transform_9, window_bounds = array<i64: 32, 8>}, {pipeline_mode = #tpu.pipeline_mode<synchronous>, transform_indices = @transform_10, window_bounds = array<i64: 1, 8>}, {pipeline_mode = #tpu.pipeline_mode<synchronous>, transform_indices = @transform_11, window_bounds = array<i64: 4, 32>}, {pipeline_mode = #tpu.pipeline_mode<synchronous>, transform_indices = @transform_12, window_bounds = array<i64: 4, 32>}, {pipeline_mode = #tpu.pipeline_mode<synchronous>, transform_indices = @transform_13, window_bounds = array<i64: 4, 4>}, {pipeline_mode = #tpu.pipeline_mode<synchronous>, transform_indices = @transform_14, window_bounds = array<i64: 4, 16, 8>}, {pipeline_mode = #tpu.pipeline_mode<synchronous>, transform_indices = @transform_15, window_bounds = array<i64: 4, 16, 8>}]} {
    %0 = tpu.iota {dimensions = array<i32: 1>} : vector<4x16xi32>
    %c0 = arith.constant 0 : index
    %c0_0 = arith.constant 0 : index
    %1 = vector.load %arg5[%c0, %c0_0] : memref<4x1xi32, #tpu.memory_space<vmem>>, vector<4x1xi32>
    %2 = vector.broadcast %1 : vector<4x1xi32> to vector<4x16xi32>
    %3 = arith.cmpi slt, %0, %2 : vector<4x16xi32>
    %4 = arith.extui %3 : vector<4x16xi1> to vector<4x16xi32>
    %5 = arith.sitofp %4 : vector<4x16xi32> to vector<4x16xf32>
    %c0_1 = arith.constant 0 : index
    %c0_2 = arith.constant 0 : index
    %c0_3 = arith.constant 0 : index
    %6 = vector.load %arg1[%c0_1, %c0_2, %c0_3] : memref<4x16x8xf32, #tpu.memory_space<vmem>>, vector<4x16x8xf32>
    %7 = vector.shape_cast %5 : vector<4x16xf32> to vector<4x16x1xf32>
    %8 = vector.broadcast %7 : vector<4x16x1xf32> to vector<4x16x8xf32>
    %9 = arith.mulf %6, %8 : vector<4x16x8xf32>
    %cst = arith.constant dense<0.000000e+00> : vector<4x8xf32>
    %10 = vector.multi_reduction <add>, %9, %cst [1] : vector<4x16x8xf32> to vector<4x8xf32>
    %cst_4 = arith.constant dense<0.000000e+00> : vector<4xf32>
    %11 = vector.multi_reduction <add>, %5, %cst_4 [1] : vector<4x16xf32> to vector<4xf32>
    %12 = vector.shape_cast %11 : vector<4xf32> to vector<4x1xf32>
    %cst_5 = arith.constant 9.99999971E-10 : f32
    %13 = vector.broadcast %cst_5 : f32 to vector<4x1xf32>
    %14 = arith.maximumf %12, %13 : vector<4x1xf32>
    %15 = tpu.reciprocal %14 : vector<4x1xf32> -> vector<4x1xf32>
    %16 = vector.broadcast %15 : vector<4x1xf32> to vector<4x8xf32>
    %17 = arith.mulf %10, %16 : vector<4x8xf32>
    %c0_6 = arith.constant 0 : index
    %c0_7 = arith.constant 0 : index
    %18 = vector.load %arg8[%c0_6, %c0_7] : memref<8x32xf32, #tpu.memory_space<vmem>>, vector<8x32xf32>
    %cst_8 = arith.constant dense<0.000000e+00> : vector<4x32xf32>
    %19 = tpu.matmul %17, %18, %cst_8 {dimension_numbers = #tpu.dot_dimension_numbers<[1], [0], [0], [1], [0, 0, 1, 1], [], []>, precision = #tpu.contract_precision<fp32>} : vector<4x8xf32>, vector<8x32xf32>, vector<4x32xf32> -> vector<4x32xf32>
    %c0_9 = arith.constant 0 : index
    %c0_10 = arith.constant 0 : index
    %20 = vector.load %arg9[%c0_9, %c0_10] : memref<1x32xf32, #tpu.memory_space<vmem>>, vector<1x32xf32>
    %21 = vector.broadcast %20 : vector<1x32xf32> to vector<4x32xf32>
    %22 = arith.addf %19, %21 : vector<4x32xf32>
    %c0_11 = arith.constant 0 : index
    %c0_12 = arith.constant 0 : index
    %23 = vector.load %arg13[%c0_11, %c0_12] : memref<4x32xf32, #tpu.memory_space<vmem>>, vector<4x32xf32>
    tpu.vector_store %arg13[%c0_11, %c0_12], %22 {strides = array<i32>} : memref<4x32xf32, #tpu.memory_space<vmem>>, vector<4x32xf32>,
    %c0_13 = arith.constant 0 : index
    %c0_14 = arith.constant 0 : index
    %24 = vector.load %arg4[%c0_13, %c0_14] : memref<4x32xf32, #tpu.memory_space<vmem>>, vector<4x32xf32>
    %c0_15 = arith.constant 0 : index
    %c0_16 = arith.constant 0 : index
    %25 = vector.load %arg6[%c0_15, %c0_16] : memref<32x32xf32, #tpu.memory_space<vmem>>, vector<32x32xf32>
    %cst_17 = arith.constant dense<0.000000e+00> : vector<4x32xf32>
    %26 = tpu.matmul %24, %25, %cst_17 {dimension_numbers = #tpu.dot_dimension_numbers<[1], [0], [0], [1], [0, 0, 1, 1], [], []>, precision = #tpu.contract_precision<fp32>} : vector<4x32xf32>, vector<32x32xf32>, vector<4x32xf32> -> vector<4x32xf32>
    %c0_18 = arith.constant 0 : index
    %c0_19 = arith.constant 0 : index
    %27 = vector.load %arg7[%c0_18, %c0_19] : memref<1x32xf32, #tpu.memory_space<vmem>>, vector<1x32xf32>
    %28 = vector.broadcast %27 : vector<1x32xf32> to vector<4x32xf32>
    %29 = arith.addf %26, %28 : vector<4x32xf32>
    %c0_20 = arith.constant 0 : index
    %c0_21 = arith.constant 0 : index
    %30 = vector.load %arg12[%c0_20, %c0_21] : memref<4x32xf32, #tpu.memory_space<vmem>>, vector<4x32xf32>
    tpu.vector_store %arg12[%c0_20, %c0_21], %29 {strides = array<i32>} : memref<4x32xf32, #tpu.memory_space<vmem>>, vector<4x32xf32>,
    %c0_22 = arith.constant 0 : index
    %c0_23 = arith.constant 0 : index
    %31 = vector.load %arg3[%c0_22, %c0_23] : memref<4x8xf32, #tpu.memory_space<vmem>>, vector<4x8xf32>
    %c0_24 = arith.constant 0 : index
    %c0_25 = arith.constant 0 : index
    %c0_26 = arith.constant 0 : index
    %32 = vector.load %arg2[%c0_24, %c0_25, %c0_26] : memref<4x8x32xf32, #tpu.memory_space<vmem>>, vector<4x8x32xf32>
    %33 = vector.shape_cast %31 : vector<4x8xf32> to vector<4x8x1xf32>
    %34 = vector.broadcast %33 : vector<4x8x1xf32> to vector<4x8x32xf32>
    %35 = arith.mulf %32, %34 : vector<4x8x32xf32>
    %cst_27 = arith.constant dense<0.000000e+00> : vector<4x32xf32>
    %36 = vector.multi_reduction <add>, %35, %cst_27 [1] : vector<4x8x32xf32> to vector<4x32xf32>
    %cst_28 = arith.constant dense<0.000000e+00> : vector<4xf32>
    %37 = vector.multi_reduction <add>, %31, %cst_28 [1] : vector<4x8xf32> to vector<4xf32>
    %38 = vector.shape_cast %37 : vector<4xf32> to vector<4x1xf32>
    %cst_29 = arith.constant 9.99999971E-10 : f32
    %39 = vector.broadcast %cst_29 : f32 to vector<4x1xf32>
    %40 = arith.maximumf %38, %39 : vector<4x1xf32>
    %41 = tpu.reciprocal %40 : vector<4x1xf32> -> vector<4x1xf32>
    %42 = vector.broadcast %41 : vector<4x1xf32> to vector<4x32xf32>
    %43 = arith.mulf %36, %42 : vector<4x32xf32>
    %44 = arith.mulf %43, %43 : vector<4x32xf32>
    %cst_30 = arith.constant dense<0.000000e+00> : vector<4xf32>
    %45 = vector.multi_reduction <add>, %44, %cst_30 [1] : vector<4x32xf32> to vector<4xf32>
    %46 = vector.shape_cast %45 : vector<4xf32> to vector<4x1xf32>
    %cst_31 = arith.constant 1.000000e-24 : f32
    %47 = vector.broadcast %cst_31 : f32 to vector<4x1xf32>
    %48 = arith.maximumf %46, %47 : vector<4x1xf32>
    %49 = math.rsqrt %48 : vector<4x1xf32>
    %50 = vector.broadcast %49 : vector<4x1xf32> to vector<4x32xf32>
    %51 = arith.mulf %43, %50 : vector<4x32xf32>
    %52 = arith.mulf %51, %51 : vector<4x32xf32>
    %cst_32 = arith.constant dense<0.000000e+00> : vector<4xf32>
    %53 = vector.multi_reduction <add>, %52, %cst_32 [1] : vector<4x32xf32> to vector<4xf32>
    %54 = vector.shape_cast %53 : vector<4xf32> to vector<4x1xf32>
    %cst_33 = arith.constant 1.000000e-16 : f32
    %55 = vector.broadcast %cst_33 : f32 to vector<4x1xf32>
    %56 = arith.maximumf %54, %55 : vector<4x1xf32>
    %57 = math.rsqrt %56 : vector<4x1xf32>
    %58 = vector.broadcast %57 : vector<4x1xf32> to vector<4x32xf32>
    %59 = arith.mulf %51, %58 : vector<4x32xf32>
    %cst_34 = arith.constant dense<0.000000e+00> : vector<4x4xf32>
    %60 = tpu.matmul %59, %59, %cst_34 {dimension_numbers = #tpu.dot_dimension_numbers<[1], [1], [0], [0], [0, 0, 1, 0], [], []>, precision = #tpu.contract_precision<fp32>} : vector<4x32xf32>, vector<4x32xf32>, vector<4x4xf32> -> vector<4x4xf32>
    %c0_35 = arith.constant 0 : index
    %c0_36 = arith.constant 0 : index
    %61 = vector.load %arg14[%c0_35, %c0_36] : memref<4x4xf32, #tpu.memory_space<vmem>>, vector<4x4xf32>
    tpu.vector_store %arg14[%c0_35, %c0_36], %60 {strides = array<i32>} : memref<4x4xf32, #tpu.memory_space<vmem>>, vector<4x4xf32>,
    %c0_37 = arith.constant 0 : index
    %c0_38 = arith.constant 0 : index
    %62 = vector.load %arg10[%c0_37, %c0_38] : memref<32x8xf32, #tpu.memory_space<vmem>>, vector<32x8xf32>
    %c0_39 = arith.constant 0 : index
    %c0_40 = arith.constant 0 : index
    %63 = vector.load %arg11[%c0_39, %c0_40] : memref<1x8xf32, #tpu.memory_space<vmem>>, vector<1x8xf32>
    %64 = vector.shape_cast %5 : vector<4x16xf32> to vector<4x16x1xf32>
    %cst_41 = arith.constant dense<0.000000e+00> : vector<4x8xf32>
    %65 = tpu.matmul %29, %62, %cst_41 {dimension_numbers = #tpu.dot_dimension_numbers<[1], [0], [0], [1], [0, 0, 1, 1], [], []>, precision = #tpu.contract_precision<fp32>} : vector<4x32xf32>, vector<32x8xf32>, vector<4x8xf32> -> vector<4x8xf32>
    %66 = vector.broadcast %63 : vector<1x8xf32> to vector<4x8xf32>
    %67 = arith.addf %65, %66 : vector<4x8xf32>
    %cst_42 = arith.constant dense<0.000000e+00> : vector<4x8xf32>
    %68 = tpu.matmul %22, %62, %cst_42 {dimension_numbers = #tpu.dot_dimension_numbers<[1], [0], [0], [1], [0, 0, 1, 1], [], []>, precision = #tpu.contract_precision<fp32>} : vector<4x32xf32>, vector<32x8xf32>, vector<4x8xf32> -> vector<4x8xf32>
    %69 = vector.broadcast %63 : vector<1x8xf32> to vector<4x8xf32>
    %70 = arith.addf %68, %69 : vector<4x8xf32>
    %71 = vector.shape_cast %67 : vector<4x8xf32> to vector<4x1x8xf32>
    %72 = vector.broadcast %71 : vector<4x1x8xf32> to vector<4x16x8xf32>
    %73 = vector.broadcast %64 : vector<4x16x1xf32> to vector<4x16x8xf32>
    %74 = arith.mulf %72, %73 : vector<4x16x8xf32>
    %c0_43 = arith.constant 0 : index
    %c0_44 = arith.constant 0 : index
    %c0_45 = arith.constant 0 : index
    %75 = vector.load %arg15[%c0_43, %c0_44, %c0_45] : memref<4x16x8xf32, #tpu.memory_space<vmem>>, vector<4x16x8xf32>
    tpu.vector_store %arg15[%c0_43, %c0_44, %c0_45], %74 {strides = array<i32>} : memref<4x16x8xf32, #tpu.memory_space<vmem>>, vector<4x16x8xf32>,
    %76 = vector.shape_cast %70 : vector<4x8xf32> to vector<4x1x8xf32>
    %77 = vector.broadcast %76 : vector<4x1x8xf32> to vector<4x16x8xf32>
    %78 = vector.broadcast %64 : vector<4x16x1xf32> to vector<4x16x8xf32>
    %79 = arith.mulf %77, %78 : vector<4x16x8xf32>
    %c0_46 = arith.constant 0 : index
    %c0_47 = arith.constant 0 : index
    %c0_48 = arith.constant 0 : index
    %80 = vector.load %arg16[%c0_46, %c0_47, %c0_48] : memref<4x16x8xf32, #tpu.memory_space<vmem>>, vector<4x16x8xf32>
    tpu.vector_store %arg16[%c0_46, %c0_47, %c0_48], %79 {strides = array<i32>} : memref<4x16x8xf32, #tpu.memory_space<vmem>>, vector<4x16x8xf32>,
    return
  }
  func.func @transform_0(%arg0: i32) -> (i32, i32, i32) {
    %c0_i32 = arith.constant 0 : i32
    %c0_i32_0 = arith.constant 0 : i32
    %c0_i32_1 = arith.constant 0 : i32
    %c0_i32_2 = arith.constant 0 : i32
    return %c0_i32, %c0_i32_0, %c0_i32_1 : i32, i32, i32
  }
  func.func @transform_1(%arg0: i32) -> (i32, i32, i32) {
    %c0_i32 = arith.constant 0 : i32
    %c0_i32_0 = arith.constant 0 : i32
    %c0_i32_1 = arith.constant 0 : i32
    %c0_i32_2 = arith.constant 0 : i32
    return %c0_i32, %c0_i32_0, %c0_i32_1 : i32, i32, i32
  }
  func.func @transform_2(%arg0: i32) -> (i32, i32) {
    %c0_i32 = arith.constant 0 : i32
    %c0_i32_0 = arith.constant 0 : i32
    %c0_i32_1 = arith.constant 0 : i32
    return %c0_i32, %c0_i32_0 : i32, i32
  }
  func.func @transform_3(%arg0: i32) -> (i32, i32) {
    %c0_i32 = arith.constant 0 : i32
    %c0_i32_0 = arith.constant 0 : i32
    %c0_i32_1 = arith.constant 0 : i32
    return %c0_i32, %c0_i32_0 : i32, i32
  }
  func.func @transform_4(%arg0: i32) -> (i32, i32) {
    %c0_i32 = arith.constant 0 : i32
    %c0_i32_0 = arith.constant 0 : i32
    %c0_i32_1 = arith.constant 0 : i32
    return %c0_i32, %c0_i32_0 : i32, i32
  }
  func.func @transform_5(%arg0: i32) -> (i32, i32) {
    %c0_i32 = arith.constant 0 : i32
    %c0_i32_0 = arith.constant 0 : i32
    %c0_i32_1 = arith.constant 0 : i32
    return %c0_i32, %c0_i32_0 : i32, i32
  }
  func.func @transform_6(%arg0: i32) -> (i32, i32) {
    %c0_i32 = arith.constant 0 : i32
    %c0_i32_0 = arith.constant 0 : i32
    %c0_i32_1 = arith.constant 0 : i32
    return %c0_i32, %c0_i32_0 : i32, i32
  }
  func.func @transform_7(%arg0: i32) -> (i32, i32) {
    %c0_i32 = arith.constant 0 : i32
    %c0_i32_0 = arith.constant 0 : i32
    %c0_i32_1 = arith.constant 0 : i32
    return %c0_i32, %c0_i32_0 : i32, i32
  }
  func.func @transform_8(%arg0: i32) -> (i32, i32) {
    %c0_i32 = arith.constant 0 : i32
    %c0_i32_0 = arith.constant 0 : i32
    %c0_i32_1 = arith.constant 0 : i32
    return %c0_i32, %c0_i32_0 : i32, i32
  }
  func.func @transform_9(%arg0: i32) -> (i32, i32) {
    %c0_i32 = arith.constant 0 : i32
    %c0_i32_0 = arith.constant 0 : i32
    %c0_i32_1 = arith.constant 0 : i32
    return %c0_i32, %c0_i32_0 : i32, i32
  }
  func.func @transform_10(%arg0: i32) -> (i32, i32) {
    %c0_i32 = arith.constant 0 : i32
    %c0_i32_0 = arith.constant 0 : i32
    %c0_i32_1 = arith.constant 0 : i32
    return %c0_i32, %c0_i32_0 : i32, i32
  }
  func.func @transform_11(%arg0: i32) -> (i32, i32) {
    %c0_i32 = arith.constant 0 : i32
    %c0_i32_0 = arith.constant 0 : i32
    %c0_i32_1 = arith.constant 0 : i32
    return %c0_i32, %c0_i32_0 : i32, i32
  }
  func.func @transform_12(%arg0: i32) -> (i32, i32) {
    %c0_i32 = arith.constant 0 : i32
    %c0_i32_0 = arith.constant 0 : i32
    %c0_i32_1 = arith.constant 0 : i32
    return %c0_i32, %c0_i32_0 : i32, i32
  }
  func.func @transform_13(%arg0: i32) -> (i32, i32) {
    %c0_i32 = arith.constant 0 : i32
    %c0_i32_0 = arith.constant 0 : i32
    %c0_i32_1 = arith.constant 0 : i32
    return %c0_i32, %c0_i32_0 : i32, i32
  }
  func.func @transform_14(%arg0: i32) -> (i32, i32, i32) {
    %c0_i32 = arith.constant 0 : i32
    %c0_i32_0 = arith.constant 0 : i32
    %c0_i32_1 = arith.constant 0 : i32
    %c0_i32_2 = arith.constant 0 : i32
    return %c0_i32, %c0_i32_0, %c0_i32_1 : i32, i32, i32
  }
  func.func @transform_15(%arg0: i32) -> (i32, i32, i32) {
    %c0_i32 = arith.constant 0 : i32
    %c0_i32_0 = arith.constant 0 : i32
    %c0_i32_1 = arith.constant 0 : i32
    %c0_i32_2 = arith.constant 0 : i32
    return %c0_i32, %c0_i32_0, %c0_i32_1 : i32, i32, i32
  }
}

</mosaic_0001>

<bundles_post_ra>
// kernel: tpu_custom_call.1
= control target key start
LH: loop header
LB: loop body
LE: loop exit
PB: predicated region body
PF: predicated region fallthrough
CT: control target
= control target key end

     0   :  { %21 = vsyncpa [#allocation3], 0  ;;  %v3363_v1 = vmov 0   ;;  %v3364_v2 = vmov 0.0   ;;  %s4048_s0 = inlined_call_operand.vmem [shape: f32[4,16,8], index: 0, kind: input, shape index: {}]   ;;  %s4049_s1 = inlined_call_operand.vmem [shape: f32[4,8,32], index: 1, kind: input, shape index: {}]   ;;  %s4050_s2 = inlined_call_operand.vmem [shape: f32[4,8], index: 2, kind: input, shape index: {}]   ;;  %s4051_s3 = inlined_call_operand.vmem [shape: f32[4,32], index: 3, kind: input, shape index: {}]   ;;  %s4052_s4 = inlined_call_operand.vmem [shape: s32[4,1], index: 4, kind: input, shape index: {}]   ;;  %s4053_s5 = inlined_call_operand.vmem [shape: f32[32,32], index: 5, kind: input, shape index: {}]   ;;  %s4054_s6 = inlined_call_operand.vmem [shape: f32[1,32], index: 6, kind: input, shape index: {}]   ;;  %s4055_s7 = inlined_call_operand.vmem [shape: f32[8,32], index: 7, kind: input, shape index: {}]   ;;  %s4056_s8 = inlined_call_operand.vmem [shape: f32[1,32], index: 8, kind: input, shape index: {}]   ;;  %s4057_s9 = inlined_call_operand.vmem [shape: f32[32,8], index: 9, kind: input, shape index: {}]   ;;  %s4058_s10 = inlined_call_operand.vmem [shape: f32[1,8], index: 10, kind: input, shape index: {}]   ;;  %s4059_s11 = inlined_call_operand.hbm [shape: f32[4,32], index: 11, kind: output, shape index: {0}]   ;;  %s4060_s12 = inlined_call_operand.hbm [shape: f32[4,32], index: 12, kind: output, shape index: {1}]   ;;  %s4061_s13 = inlined_call_operand.hbm [shape: f32[4,4], index: 13, kind: output, shape index: {2}]   ;;  %s4062_s14 = inlined_call_operand.vmem [shape: f32[4,16,8], index: 14, kind: output, shape index: {3}]   ;;  %s4063_s15 = inlined_call_operand.vmem [shape: f32[4,16,8], index: 15, kind: output, shape index: {4}]  }
   0x1   :  { %v47_v0 = vld [vmem:[%s4052_s4] sm:$0xf]  ;;  %3290 = vset.pattern.permute.xlu0 %v3363_v1  ;;  %3030 = vmatprep.subr.mxu1 %v3364_v2 }
   0x2   :  { %22 = vsyncpa [#allocation5], 0  ;;  %49 = vperm.xlu0 %3290, %v47_v0   ;;  %3025 = vmatprep.subr.mxu0 %v3364_v2  ;;  %v45_v3 = vlaneseq  ;;  %vm151_vm0 = vcmask 125952   ;;  %v1142_v15 = vld [vmem:[%s4050_s2] sm:$0xf]  ;;  %vm3365_vm2 = vmmov 0  }
   0x3   :  { %v169_v22 = vld [vmem:[%s4055_s7] sm:$0xff]  ;;  %3032 = vmatprep.mubr.msk.f32.mxu1 %vm3365_vm2, %v3364_v2  ;;  %3027 = vmatprep.mubr.msk.f32.mxu0 %vm3365_vm2, %v3364_v2  ;;  %vm1207_vm3 = vcmask 60416   ;;  %v57_v30 = vld [vmem:[%s4048_s0 + $0x18] sm:$0xff]  ;;  %v56_v32 = vld [vmem:[%s4048_s0 + $0x10] sm:$0xff]  ;;  %vm114_vm4 = vcmask 64512   ;;  %vm182_vm5 = vcmask 1041409  }
   0x4   :  { %v3455_v4 = vshrl.u32 %v45_v3, 7  ;;  %v46_v5 = vand.u32 127, %v45_v3  ;;  %v3472_v23 = vand.u32 4294901760, %v169_v22  ;;  %v1208_v28 = vsel %vm1207_vm3, %v1142_v15, 0.0  ;;  %v58_v34 = vld [vmem:[%s4048_s0 + $0x20] sm:$0xff]  ;;  %v59_v37 = vld [vmem:[%s4048_s0 + $0x28] sm:$0xff] }
   0x5   :  { %v54_v47 = vld [vmem:[%s4048_s0] sm:$0xff]  ;;  %v55_v50 = vld [vmem:[%s4048_s0 + $0x8] sm:$0xff]  ;;  %v60_v62 = vld [vmem:[%s4048_s0 + $0x30] sm:$0xff]  ;;  %vm185_vm6 = vcmask 1042434   ;;  %vm188_vm7 = vcmask 1043459   ;;  %vm652_vm8 = vcmask 261120  }
   0x6   :  { %v75_v6 = vsub.s32 1, %v3455_v4  ;;  %v86_v11 = vsub.s32 2, %v3455_v4  ;;  %v3461_v13 = vsub.s32 0, %v3455_v4  ;;  %v97_v17 = vsub.s32 3, %v3455_v4  ;;  %3026 = vmatpush3.msra.mxu0 %v3472_v23  ;;  %v61_v1 = vld [vmem:[%s4048_s0 + $0x38] sm:$0xff]  ;;  %s3367_s25 = smov [#allocation2]  }
   0x7   :  { %v3479_v24 = vsub.f32 %v169_v22, %v3472_v23  ;;  %3035 = vmatprep.subr.mxu0 %v3364_v2  ;;  %vm638_vm9 = vcmask 257024   ;;  %s2864_s26 = sshll.u32 %s3367_s25, 4  ;;  %s2865_s26 = int_to_ptr.vmem [resolvable:$true] %s2864_s26 }
   0x8   :  { %v1157_v16 = vrot.slane %v1142_v15, %v75_v6  ;;  %v1164_v18 = vrot.slane %v1142_v15, %v86_v11  ;;  %v1150_v20 = vrot.slane %v1142_v15, %v3461_v13  ;;  %v1171_v21 = vrot.slane %v1142_v15, %v97_v17 }
   0x9   :  { %v301_v25 = vand.u32 4294901760, %v3479_v24 }
   0xb   :  { %v302_v26 = vsub.f32 %v3479_v24, %v301_v25 }
   0xd   :  { %v303_v27 = vand.u32 4294901760, %v302_v26 }
   0xf   :  { %3031 = vmatpush3.msra.mxu1 %v303_v27 }
  0x10   :  { %3040 = vmatprep.subr.mxu1 %v3364_v2 }
  0x7d   :  { %v50_v7 = vpop.permute.xlu0 %49 }
  0x7e   :  { %vm51_vm1 = vcmp.lt.s32.totalorder %v46_v5, %v50_v7 }
  0x7f   :  { %v2907_v8 = vsel %vm51_vm1, 1.0, %v3364_v2 }
  0x80   :  { %v152_v9 = vsel %vm151_vm0, %v2907_v8, 0.0  ;;  %v76_v10 = vrot.slane %v2907_v8, %v75_v6  ;;  %v87_v12 = vrot.slane %v2907_v8, %v86_v11  ;;  %v65_v14 = vrot.slane %v2907_v8, %v3461_v13 }
  0x81   :  { %153 = vadd.xlane.f32.xlu0 %v152_v9  ;;  %v98_v19 = vrot.slane %v2907_v8, %v97_v17 }
  0x82   :  { %78 = vbcast.lane.b32.xlu1 %v76_v10, 256 }
  0x86   :  { %82 = vbcast.lane.b32.xlu1 %v76_v10, 264 }
  0x8a   :  { %89 = vbcast.lane.b32.xlu1 %v87_v12, 256 }
  0x8e   :  { %93 = vbcast.lane.b32.xlu1 %v87_v12, 264 }
  0x92   :  { %67 = vbcast.lane.b32.xlu1 %v65_v14, 256 }
  0x96   :  { %71 = vbcast.lane.b32.xlu1 %v65_v14, 264 }
  0x97   :  { %1159 = vbcast.lane.b32.xlu0 %v1157_v16, 256 }
  0x9a   :  { %100 = vbcast.lane.b32.xlu1 %v98_v19, 256 }
  0x9b   :  { %1166 = vbcast.lane.b32.xlu0 %v1164_v18, 256 }
  0x9e   :  { %104 = vbcast.lane.b32.xlu1 %v98_v19, 264 }
  0x9f   :  { %1152 = vbcast.lane.b32.xlu0 %v1150_v20, 256 }
  0xa3   :  { %1173 = vbcast.lane.b32.xlu0 %v1171_v21, 256 }
  0xc2   :  { %1209 = vadd.xlane.f32.xlu1 %v1208_v28 }
  0xf4   :  { %v3488_v29 = vpop.permute.xlu1 %78 }
  0xf5   :  { %v108_v36 = vmul.f32 %v3488_v29, %v56_v32 }
  0xf7   :  { %v124_v41 = vsel %vm114_vm4, %v108_v36, 0.0 }
  0xf8   :  { %v3493_v31 = vpop.permute.xlu1 %82 }
  0xf9   :  { %v109_v33 = vmul.f32 %v3493_v31, %v57_v30 }
  0xfb   :  { %v125_v38 = vsel %vm114_vm4, %v109_v33, 0.0 }
  0xfc   :  { %v3502_v35 = vpop.permute.xlu1 %89  ;;  %v126_v43 = vadd.f32 %v125_v38, %v124_v41 }
  0xfd   :  { %v110_v39 = vmul.f32 %v3502_v35, %v58_v34 }
  0xfe   :  { %v127_v49 = vrot.slane %v126_v43, 4 }
  0xff   :  { %v133_v44 = vsel %vm114_vm4, %v110_v39, 0.0  ;;  %v644_v39 = vld [vmem:[%s4053_s5 + $0x18] sm:$0xff] }
 0x100   :  { %v3510_v40 = vpop.permute.xlu1 %93  ;;  %v128_v55 = vadd.f32 %v127_v49, %v126_v43  ;;  %v643_v43 = vld [vmem:[%s4053_s5 + $0x10] sm:$0xff] }
 0x101   :  { %v111_v42 = vmul.f32 %v3510_v40, %v59_v37 }
 0x102   :  { %v129_v3 = vrot.slane %v128_v55, 2 }
 0x103   :  { %v134_v45 = vsel %vm114_vm4, %v111_v42, 0.0 }
 0x104   :  { %v135_v46 = vadd.f32 %v134_v45, %v133_v44  ;;  %v3519_v48 = vpop.permute.xlu1 %67  ;;  %v130_v11 = vadd.f32 %v129_v3, %v128_v55 }
 0x105   :  { %v106_v52 = vmul.f32 %v3519_v48, %v54_v47  ;;  %v3550_v47 = vand.u32 4294901760, %v644_v39 }
 0x106   :  { %v136_v51 = vrot.slane %v135_v46, 4  ;;  %v131_v19 = vrot.slane %v130_v11, 1 }
 0x107   :  { %v115_v58 = vsel %vm114_vm4, %v106_v52, 0.0  ;;  %v3553_v52 = vand.u32 4294901760, %v643_v43 }
 0x108   :  { %v3525_v53 = vpop.permute.xlu1 %71  ;;  %v137_v57 = vadd.f32 %v136_v51, %v135_v46  ;;  %v132_v28 = vadd.f32 %v131_v19, %v130_v11 }
 0x109   :  { %v107_v54 = vmul.f32 %v3525_v53, %v55_v50 }
 0x10a   :  { %v154_v56 = vpop.xlane.xlu0 %153  ;;  %v138_v5 = vrot.slane %v137_v57, 2 }
 0x10b   :  { %v116_v59 = vsel %vm114_vm4, %v107_v54, 0.0  ;;  %v155_v60 = vmax.f32 %v154_v56, 1e-09  ;;  %v642_v54 = vld [vmem:[%s4053_s5 + $0x8] sm:$0xff]  ;;  %v3559_v56 = vsub.f32 %v644_v39, %v3550_v47  ;;  %v1146_v39 = vld [vmem:[%s4049_s1 + $0x18] sm:$0xff] }
 0x10c   :  { %v117_v61 = vadd.f32 %v116_v59, %v115_v58  ;;  %v3533_v63 = vpop.permute.xlu1 %100  ;;  %v139_v12 = vadd.f32 %v138_v5, %v137_v57  ;;  %v3562_v58 = vand.u32 4294901760, %v642_v54  ;;  %v641_v59 = vld [vmem:[%s4053_s5] sm:$0xff] }
 0x10d   :  { %3291 = vrcp.f32 %v155_v60  ;;  %v112_v6 = vmul.f32 %v3533_v63, %v60_v62  ;;  %v3573_v3 = vand.u32 4294901760, %v641_v59  ;;  %v640_v5 = vld [vmem:[%s4051_s3] sm:$0xf] }
 0x10e   :  { %v118_v0 = vrot.slane %v117_v61, 4  ;;  %v140_v20 = vrot.slane %v139_v12, 1 }
 0x10f   :  { %v142_v14 = vsel %vm114_vm4, %v112_v6, 0.0  ;;  %v3579_v6 = vsub.f32 %v642_v54, %v3562_v58 }
 0x110   :  { %v119_v7 = vadd.f32 %v118_v0, %v117_v61  ;;  %v3539_v8 = vpop.permute.xlu1 %104  ;;  %v141_v30 = vadd.f32 %v140_v20, %v139_v12  ;;  %v3569_v61 = vsub.f32 %v643_v43, %v3553_v52  ;;  %v1160_v12 = vpop.permute.xlu0 %1159 }
 0x111   :  { %v113_v9 = vmul.f32 %v3539_v8, %v61_v1  ;;  %v762_v1 = vand.u32 4294901760, %v3559_v56 }
 0x112   :  { %v120_v10 = vrot.slane %v119_v7, 2 }
 0x113   :  { %v143_v15 = vsel %vm114_vm4, %v113_v9, 0.0  ;;  %v769_v9 = vand.u32 4294901760, %v3569_v61 }
 0x114   :  { %v121_v16 = vadd.f32 %v120_v10, %v119_v7  ;;  %v144_v17 = vadd.f32 %v143_v15, %v142_v14  ;;  %v654_v10 = vsel %vm652_vm8, %v640_v5, 0  ;;  %v763_v14 = vsub.f32 %v3559_v56, %v762_v1 }
 0x115   :  { %v3591_v15 = vsub.f32 %v641_v59, %v3573_v3  ;;  %v3597_v19 = vand.u32 4294901760, %v654_v10 }
 0x116   :  { %v145_v18 = vrot.slane %v144_v17, 4  ;;  %v122_v21 = vrot.slane %v121_v16, 1 }
 0x118   :  { %v146_v22 = vadd.f32 %v145_v18, %v144_v17  ;;  %v123_v34 = vadd.f32 %v122_v21, %v121_v16  ;;  %v776_v16 = vand.u32 4294901760, %v3579_v6  ;;  %v770_v18 = vsub.f32 %v3569_v61, %v769_v9 }
 0x119   :  { %v764_v21 = vand.u32 4294901760, %v763_v14 }
 0x11a   :  { %v3292_v26 = vpop.eup %3291  ;;  %v147_v27 = vrot.slane %v146_v22, 2 }
 0x11b   :  { %v158_v32 = vrot.slane %v3292_v26, 1  ;;  %v159_v33 = vrot.slane %v3292_v26, 2  ;;  %v160_v45 = vrot.slane %v3292_v26, 3  ;;  %v165_v46 = vmul.f32 %v3292_v26, %v123_v34 }
 0x11c   :  { %v148_v36 = vadd.f32 %v147_v27, %v146_v22  ;;  %v783_v22 = vand.u32 4294901760, %v3591_v15  ;;  %v777_v26 = vsub.f32 %v3579_v6, %v776_v16  ;;  %v1167_v27 = vpop.permute.xlu0 %1166 }
 0x11d   :  { %v166_v37 = vmul.f32 %v158_v32, %v132_v28  ;;  %v167_v38 = vmul.f32 %v159_v33, %v141_v30  ;;  %v771_v28 = vand.u32 4294901760, %v770_v18  ;;  %v3608_v30 = vsub.f32 %v654_v10, %v3597_v19 }
 0x11e   :  { %v149_v41 = vrot.slane %v148_v36, 1  ;;  %v778_v32 = vand.u32 4294901760, %v777_v26 }
 0x11f   :  { %v181_v42 = vrot.slane %v166_v37, 7  ;;  %v184_v49 = vrot.slane %v167_v38, 6  ;;  %v727_v33 = vand.u32 4294901760, %v3608_v30  ;;  %v1143_v38 = vld [vmem:[%s4049_s1] sm:$0xff] }
 0x120   :  { %v150_v44 = vadd.f32 %v149_v41, %v148_v36  ;;  %v1153_v34 = vpop.permute.xlu0 %1152 }
 0x121   :  { %v183_v51 = vsel %vm182_vm5, %v181_v42, %v165_v46  ;;  %v728_v37 = vsub.f32 %v3608_v30, %v727_v33 }
 0x122   :  { %v168_v50 = vmul.f32 %v160_v45, %v150_v44  ;;  %v186_v57 = vsel %vm185_vm6, %v184_v49, %v183_v51  ;;  %v1175_v45 = vmul.f32 %v1153_v34, %v1143_v38 }
 0x123   :  { %v729_v42 = vand.u32 4294901760, %v728_v37 }
 0x124   :  { %v187_v55 = vrot.slane %v168_v50, 5  ;;  %v1174_v41 = vpop.permute.xlu0 %1173  ;;  %v1179_v51 = vsel %vm652_vm8, %v1175_v45, 0.0 }
 0x125   :  { %v1178_v46 = vmul.f32 %v1174_v41, %v1146_v39  ;;  %v1180_v59 = vrot.slane %v1179_v51, 4 }
 0x126   :  { %v189_v60 = vsel %vm188_vm7, %v187_v55, %v186_v57 }
 0x127   :  { %v190_v62 = vsel %vm114_vm4, %v189_v60, 0  ;;  %v1200_v54 = vsel %vm652_vm8, %v1178_v46, 0.0  ;;  %v1181_v5 = vadd.f32 %v1180_v59, %v1179_v51 }
 0x128   :  { %v258_v0 = vand.u32 4294901760, %v190_v62  ;;  %v1201_v60 = vrot.slane %v1200_v54, 4 }
 0x12a   :  { %v259_v7 = vsub.f32 %v190_v62, %v258_v0  ;;  %3033 = vmatmul.mubr.f32.vlgmr.msra.gmra.mxu1 %v258_v0  ;;  %v1202_v10 = vadd.f32 %v1201_v60, %v1200_v54 }
 0x12b   :  { %3041 = vmatpush3.msra.mxu1 %v3472_v23  ;;  %3042 = vmatprep.mubr.msk.f32.mxu1 %vm3365_vm2, %v3364_v2 }
 0x12c   :  { %v260_v11 = vand.u32 4294901760, %v259_v7  ;;  %3050 = vmatprep.subr.mxu1 %v3364_v2  ;;  %v1203_v14 = vrot.slane %v1202_v10, 2 }
 0x12e   :  { %3043 = vmatmul.mubr.f32.vlgmr.msra.gmra.mxu1 %v260_v11  ;;  %v261_v17 = vsub.f32 %v259_v7, %v260_v11 }
 0x12f   :  { %3051 = vmatpush3.msra.mxu1 %v3472_v23  ;;  %3052 = vmatprep.mubr.msk.f32.mxu1 %vm3365_vm2, %v3364_v2  ;;  %v784_v23 = vsub.f32 %v3591_v15, %v783_v22 }
 0x130   :  { %v262_v20 = vand.u32 4294901760, %v261_v17  ;;  %3066 = vmatprep.subr.mxu1 %v3364_v2 }
 0x131   :  { %v785_v36 = vand.u32 4294901760, %v784_v23 }
 0x132   :  { %3028 = vmatmul.mubr.f32.vlgmr.msra.gmra.mxu0 %v262_v20  ;;  %3053 = vmatmul.mubr.f32.vlgmr.msra.gmra.mxu1 %v258_v0 }
 0x133   :  { %3036 = vmatpush3.msra.mxu0 %v3479_v24  ;;  %3037 = vmatprep.mubr.msk.f32.mxu0 %vm3365_vm2, %v3364_v2  ;;  %v1144_v24 = vld [vmem:[%s4049_s1 + $0x8] sm:$0xff] }
 0x134   :  { %3045 = vmatprep.subr.mxu0 %v3364_v2  ;;  %3067 = vmatpush3.msra.mxu1 %v764_v21  ;;  %v1176_v43 = vmul.f32 %v1160_v12, %v1144_v24  ;;  %v1182_v12 = vrot.slane %v1181_v5, 2 }
 0x135   :  { %3068 = vmatprep.subr.mxu1 %v3364_v2  ;;  %3074 = vmatprep.mubr.msk.f32.mxu1 %vm3365_vm2, %v3364_v2 }
 0x136   :  { %3038 = vmatmul.mubr.f32.vlgmr.msra.gmra.mxu0 %v259_v7  ;;  %3069 = vmatpush3.msra.mxu1 %v771_v28  ;;  %v1186_v49 = vsel %vm652_vm8, %v1176_v43, 0.0 }
 0x137   :  { %3046 = vmatpush3.msra.mxu0 %v301_v25  ;;  %3047 = vmatprep.mubr.msk.f32.mxu0 %vm3365_vm2, %v3364_v2  ;;  %v1145_v25 = vld [vmem:[%s4049_s1 + $0x10] sm:$0xff]  ;;  %v1187_v55 = vrot.slane %v1186_v49, 4 }
 0x138   :  { %3055 = vmatprep.subr.mxu0 %v3364_v2  ;;  %3070 = vmatprep.subr.mxu1 %v3364_v2  ;;  %v1177_v44 = vmul.f32 %v1167_v27, %v1145_v25 }
 0x139   :  { %3071 = vmatpush3.msra.mxu1 %v778_v32  ;;  %v1188_v62 = vadd.f32 %v1187_v55, %v1186_v49  ;;  %v2908_v49 = vld [vmem:[%s4056_s8] ss:$0 sm:$0xff] }
 0x13a   :  { %3048 = vmatmul.mubr.f32.vlgmr.msra.gmra.mxu0 %v258_v0  ;;  %3072 = vmatprep.subr.mxu1 %v3364_v2  ;;  %v1193_v50 = vsel %vm652_vm8, %v1177_v44, 0.0 }
 0x13b   :  { %3056 = vmatpush3.msra.mxu0 %v3550_v47  ;;  %3063 = vmatprep.mubr.msk.f32.mxu0 %vm3365_vm2, %v3364_v2  ;;  %v1194_v57 = vrot.slane %v1193_v50, 4 }
 0x13c   :  { %3057 = vmatprep.subr.mxu0 %v3364_v2  ;;  %3073 = vmatpush3.msra.mxu1 %v785_v36 }
 0x13d   :  { %3058 = vmatpush3.msra.mxu0 %v3553_v52  ;;  %3088 = vmatprep.subr.mxu1 %v3364_v2  ;;  %v1195_v0 = vadd.f32 %v1194_v57, %v1193_v50 }
 0x13e   :  { %3059 = vmatprep.subr.mxu0 %v3364_v2  ;;  %3075 = vmatmul.mubr.f32.vlgmr.msra.gmra.mxu1 %v3597_v19 }
 0x13f   :  { %3060 = vmatpush3.msra.mxu0 %v3562_v58  ;;  %3089 = vmatpush3.msra.mxu1 %v3550_v47 }
 0x140   :  { %3061 = vmatprep.subr.mxu0 %v3364_v2  ;;  %3090 = vmatprep.subr.mxu1 %v3364_v2 }
 0x141   :  { %3062 = vmatpush3.msra.mxu0 %v3573_v3  ;;  %3091 = vmatpush3.msra.mxu1 %v3553_v52 }
 0x142   :  { %3077 = vmatprep.subr.mxu0 %v3364_v2  ;;  %3064 = vmatmul.mubr.f32.vlgmr.msra.gmra.mxu0 %v729_v42 }
 0x143   :  { %3078 = vmatpush3.msra.mxu0 %v3559_v56  ;;  %3092 = vmatprep.subr.mxu1 %v3364_v2  ;;  %v1189_v56 = vrot.slane %v1188_v62, 2 }
 0x144   :  { %3079 = vmatprep.subr.mxu0 %v3364_v2  ;;  %3093 = vmatpush3.msra.mxu1 %v3562_v58 }
 0x145   :  { %3080 = vmatpush3.msra.mxu0 %v3569_v61  ;;  %3085 = vmatprep.mubr.msk.f32.mxu0 %vm3365_vm2, %v3364_v2  ;;  %v1183_v61 = vadd.f32 %v1182_v12, %v1181_v5 }
 0x146   :  { %3081 = vmatprep.subr.mxu0 %v3364_v2  ;;  %3094 = vmatprep.subr.mxu1 %v3364_v2 }
 0x147   :  { %3082 = vmatpush3.msra.mxu0 %v3579_v6  ;;  %3095 = vmatpush3.msra.mxu1 %v3573_v3  ;;  %v1204_v6 = vadd.f32 %v1203_v14, %v1202_v10 }
 0x148   :  { %3083 = vmatprep.subr.mxu0 %v3364_v2  ;;  %3096 = vmatprep.mubr.msk.f32.mxu1 %vm3365_vm2, %v3364_v2 }
 0x149   :  { %3084 = vmatpush3.msra.mxu0 %v3591_v15  ;;  %3110 = vmatprep.subr.mxu1 %v3364_v2  ;;  %v1184_v15 = vrot.slane %v1183_v61, 1 }
 0x14a   :  { %3099 = vmatprep.subr.mxu0 %v3364_v2  ;;  %3086 = vmatmul.mubr.f32.vlgmr.msra.gmra.mxu0 %v3608_v30 }
 0x14b   :  { %v1210_v7 = vpop.xlane.xlu1 %1209  ;;  %3100 = vmatpush3.msra.mxu0 %v762_v1  ;;  %3097 = vmatmul.mubr.f32.vlgmr.msra.gmra.mxu1 %v727_v33  ;;  %v1196_v1 = vrot.slane %v1195_v0, 2  ;;  %v1185_v20 = vadd.f32 %v1184_v15, %v1183_v61 }
 0x14c   :  { %v1211_v11 = vmax.f32 %v1210_v7, 1e-09  ;;  %3101 = vmatprep.subr.mxu0 %v3364_v2  ;;  %3111 = vmatpush3.msra.mxu1 %v3550_v47  ;;  %v1190_v47 = vadd.f32 %v1189_v56, %v1188_v62 }
 0x14d   :  { %3102 = vmatpush3.msra.mxu0 %v769_v9  ;;  %3112 = vmatprep.subr.mxu1 %v3364_v2 }
 0x14e   :  { %3293 = vrcp.f32 %v1211_v11  ;;  %3103 = vmatprep.subr.mxu0 %v3364_v2  ;;  %3113 = vmatpush3.msra.mxu1 %v3553_v52  ;;  %v1197_v52 = vadd.f32 %v1196_v1, %v1195_v0 }
 0x14f   :  { %3104 = vmatpush3.msra.mxu0 %v776_v16  ;;  %3114 = vmatprep.subr.mxu1 %v3364_v2 }
 0x150   :  { %3105 = vmatprep.subr.mxu0 %v3364_v2  ;;  %3107 = vmatprep.mubr.msk.f32.mxu0 %vm3365_vm2, %v3364_v2  ;;  %v1198_v9 = vrot.slane %v1197_v52, 1 }
 0x151   :  { %3106 = vmatpush3.msra.mxu0 %v783_v22  ;;  %3115 = vmatpush3.msra.mxu1 %v3562_v58  ;;  %v1191_v58 = vrot.slane %v1190_v47, 1 }
 0x152   :  { %3108 = vmatmul.mubr.f32.vlgmr.msra.gmra.mxu0 %v3597_v19  ;;  %3116 = vmatprep.subr.mxu1 %v3364_v2  ;;  %v1199_v18 = vadd.f32 %v1198_v9, %v1197_v52 }
 0x153   :  { %3117 = vmatpush3.msra.mxu1 %v3573_v3  ;;  %3118 = vmatprep.mubr.msk.f32.mxu1 %vm3365_vm2, %v3364_v2  ;;  %v1205_v3 = vrot.slane %v1204_v6, 1  ;;  %v1192_v17 = vadd.f32 %v1191_v58, %v1190_v47 }
 0x154   :  { %3119 = vmatmul.mubr.f32.vlgmr.msra.gmra.mxu1 %v3597_v19  ;;  %3121 = vmatprep.subr.mxu0 %v3364_v2 }
 0x155   :  { %3123 = vmatprep.mubr.msk.f32.mxu0 %vm3365_vm2, %v3364_v2  ;;  %3126 = vmatprep.subr.mxu1 %v3364_v2  ;;  %v1206_v21 = vadd.f32 %v1205_v3, %v1204_v6 }
 0x156   :  { %3128 = vmatprep.mubr.msk.f32.mxu1 %vm3365_vm2, %v3364_v2 }
 0x15b   :  { %v3294_v16 = vpop.eup %3293 }
 0x15c   :  { %v1214_v19 = vrot.slane %v3294_v16, 1  ;;  %v1215_v22 = vrot.slane %v3294_v16, 2  ;;  %v1216_v26 = vrot.slane %v3294_v16, 3  ;;  %v1221_v27 = vmul.f32 %v3294_v16, %v1185_v20 }
 0x15e   :  { %v1222_v28 = vmul.f32 %v1214_v19, %v1192_v17  ;;  %v1223_v30 = vmul.f32 %v1215_v22, %v1199_v18  ;;  %v1224_v23 = vmul.f32 %v1216_v26, %v1206_v21  ;;  %v1225_v36 = vmul.f32 %v1221_v27, %v1221_v27 }
 0x160   :  { %v1226_v32 = vmul.f32 %v1222_v28, %v1222_v28  ;;  %v1227_v33 = vmul.f32 %v1223_v30, %v1223_v30  ;;  %v1228_v34 = vmul.f32 %v1224_v23, %v1224_v23 }
 0x162   :  { %v1233_v37 = vrot.slane %v1226_v32, 7  ;;  %v1235_v24 = vrot.slane %v1227_v33, 6  ;;  %v1237_v38 = vrot.slane %v1228_v34, 5  ;;  %v2909_v34 = vld [vmem:[%s4054_s6] ss:$0 sm:$0xff] }
 0x164   :  { %v1234_v25 = vsel %vm182_vm5, %v1233_v37, %v1225_v36 }
 0x165   :  { %v1236_v39 = vsel %vm185_vm6, %v1235_v24, %v1234_v25 }
 0x166   :  { %v1238_v41 = vsel %vm188_vm7, %v1237_v38, %v1236_v39 }
 0x167   :  { %v1240_v42 = vsel %vm638_vm9, %v1238_v41, 0.0 }
 0x168   :  { %1241 = vadd.xlane.f32.xlu1 %v1240_v42 }
 0x1ea   :  { %v340_v43 = vpop.f32.mrf.mxu1 }
 0x1ec   :  { %v3034_v44 = vpop.f32.mrf.mxu1 }
 0x1ee   :  { %v488_v45 = vpop.f32.mrf.mxu1 }
 0x1f0   :  { %v3044_v46 = vpop.f32.mrf.mxu1 }
 0x1f1   :  { %v1242_v50 = vpop.xlane.xlu1 %1241 }
 0x1f2   :  { %v1243_v51 = vmax.f32 %v1242_v50, 1e-24  ;;  %v264_v54 = vpop.f32.mrf.mxu0  ;;  %v634_v55 = vpop.f32.mrf.mxu1 }
 0x1f3   :  { %v265_v57 = vadd.f32 %v2908_v49, %v264_v54 }
 0x1f4   :  { %3295 = vrsqrt.f32 %v1243_v51  ;;  %v3029_v59 = vpop.f32.mrf.mxu0  ;;  %v3054_v60 = vpop.f32.mrf.mxu1 }
 0x1f5   :  { %v341_v62 = vadd.f32 %v340_v43, %v265_v57 }
 0x1f6   :  { %v414_v0 = vpop.f32.mrf.mxu0 }
 0x1f7   :  { %v415_v5 = vadd.f32 %v414_v0, %v341_v62 }
 0x1f8   :  { %v3039_v7 = vpop.f32.mrf.mxu0 }
 0x1f9   :  { %v489_v10 = vadd.f32 %v488_v45, %v415_v5 }
 0x1fa   :  { %v562_v11 = vpop.f32.mrf.mxu0 }
 0x1fb   :  { %v563_v56 = vadd.f32 %v562_v11, %v489_v10 }
 0x1fc   :  { %v3049_v1 = vpop.f32.mrf.mxu0 }
 0x1fd   :  { %v3719_v12 = vadd.f32 %v634_v55, %v563_v56 }
 0x1ff   :  { %639 = vst.msk [vmem:[#allocation4] sm:$0xf] %vm638_vm9, %v3719_v12 }
 0x201   :  { %v3296_v14 = vpop.eup %3295 }
 0x202   :  { %v1246_v47 = vrot.slane %v3296_v14, 1  ;;  %v1247_v52 = vrot.slane %v3296_v14, 2  ;;  %v1248_v61 = vrot.slane %v3296_v14, 3  ;;  %v1253_v6 = vmul.f32 %v3296_v14, %v1221_v27  ;;  %v731_v27 = vpop.f32.mrf.mxu0 }
 0x203   :  { %v732_v38 = vadd.f32 %v2909_v34, %v731_v27 }
 0x204   :  { %v1254_v58 = vmul.f32 %v1246_v47, %v1222_v28  ;;  %v1255_v9 = vmul.f32 %v1247_v52, %v1223_v30  ;;  %v1256_v15 = vmul.f32 %v1248_v61, %v1224_v23  ;;  %v1257_v18 = vmul.f32 %v1253_v6, %v1253_v6  ;;  %v822_v28 = vpop.f32.mrf.mxu1  ;;  %v3065_v30 = vpop.f32.mrf.mxu0  ;;  %v1752_v61 = vld [vmem:[%s4057_s9 + $0x18] sm:$0xff] }
 0x205   :  { %v823_v42 = vadd.f32 %v822_v28, %v732_v38 }
 0x206   :  { %v1258_v3 = vmul.f32 %v1254_v58, %v1254_v58  ;;  %v1259_v16 = vmul.f32 %v1255_v9, %v1255_v9  ;;  %v1260_v17 = vmul.f32 %v1256_v15, %v1256_v15  ;;  %v3076_v23 = vpop.f32.mrf.mxu1 }
 0x208   :  { %v1265_v20 = vrot.slane %v1258_v3, 7  ;;  %v1267_v21 = vrot.slane %v1259_v16, 6  ;;  %v1269_v22 = vrot.slane %v1260_v17, 5  ;;  %v1750_v16 = vld [vmem:[%s4057_s9 + $0x8] sm:$0xff] }
 0x20a   :  { %v1266_v19 = vsel %vm182_vm5, %v1265_v20, %v1257_v18  ;;  %v902_v36 = vpop.f32.mrf.mxu0 }
 0x20b   :  { %v1268_v26 = vsel %vm185_vm6, %v1267_v21, %v1266_v19  ;;  %v979_v37 = vpop.f32.mrf.mxu1  ;;  %v903_v43 = vadd.f32 %v902_v36, %v823_v42  ;;  %v1749_v19 = vld [vmem:[%s4057_s9] sm:$0xff] }
 0x20c   :  { %v1270_v32 = vsel %vm188_vm7, %v1269_v22, %v1268_v26  ;;  %v3087_v24 = vpop.f32.mrf.mxu0  ;;  %v3756_v22 = vand.u32 4294901760, %v1750_v16 }
 0x20d   :  { %v1272_v33 = vsel %vm638_vm9, %v1270_v32, 0.0  ;;  %v3098_v25 = vpop.f32.mrf.mxu1  ;;  %v980_v44 = vadd.f32 %v979_v37, %v903_v43 }
 0x20e   :  { %1273 = vadd.xlane.f32.xlu0 %v1272_v33  ;;  %v3760_v33 = vand.u32 4294901760, %v1749_v19  ;;  %v3771_v30 = vsub.f32 %v1750_v16, %v3756_v22 }
 0x210   :  { %v3782_v36 = vsub.f32 %v1749_v19, %v3760_v33  ;;  %v3789_v24 = vand.u32 4294901760, %v3771_v30 }
 0x212   :  { %v1062_v39 = vpop.f32.mrf.mxu0  ;;  %v1884_v42 = vsub.f32 %v3771_v30, %v3789_v24 }
 0x213   :  { %v1063_v45 = vadd.f32 %v1062_v39, %v980_v44  ;;  %v3799_v39 = vand.u32 4294901760, %v3782_v36 }
 0x214   :  { %v3109_v41 = vpop.f32.mrf.mxu0  ;;  %v1137_v46 = vpop.f32.mrf.mxu1 }
 0x215   :  { %v1138_v49 = vadd.f32 %v1137_v46, %v1063_v45  ;;  %v1891_v45 = vsub.f32 %v3782_v36, %v3799_v39  ;;  %v3820_v46 = vand.u32 4294901760, %v1884_v42 }
 0x216   :  { %v3120_v50 = vpop.f32.mrf.mxu1 }
 0x217   :  { %1141 = vst.msk [vmem:[#allocation2] sm:$0xf] %vm638_vm9, %v1138_v49  ;;  %v1761_v17 = vsel %vm652_vm8, %v1138_v49, 0  ;;  %v3827_v50 = vand.u32 4294901760, %v1891_v45 }
 0x218   :  { %v3758_v26 = vand.u32 4294901760, %v1761_v17 }
 0x21a   :  { %v3774_v23 = vsub.f32 %v1761_v17, %v3758_v26 }
 0x21c   :  { %v1834_v25 = vand.u32 4294901760, %v3774_v23 }
 0x21e   :  { %v1835_v43 = vsub.f32 %v3774_v23, %v1834_v25 }
 0x220   :  { %v1836_v49 = vand.u32 4294901760, %v1835_v43 }
 0x297   :  { %v1274_v51 = vpop.xlane.xlu0 %1273 }
 0x298   :  { %v1275_v54 = vmax.f32 %v1274_v51, 1e-16  ;;  %v2249_v51 = vsel %vm652_vm8, %v3719_v12, 0 }
 0x29a   :  { %3297 = vrsqrt.f32 %v1275_v54  ;;  %v3856_v54 = vand.u32 4294901760, %v2249_v51 }
 0x29c   :  { %v2321_v12 = vsub.f32 %v2249_v51, %v3856_v54 }
 0x2a7   :  { %v3298_v55 = vpop.eup %3297 }
 0x2a8   :  { %v1278_v57 = vrot.slane %v3298_v55, 1  ;;  %v1279_v59 = vrot.slane %v3298_v55, 2  ;;  %v1280_v60 = vrot.slane %v3298_v55, 3  ;;  %v1285_v7 = vmul.f32 %v3298_v55, %v1253_v6  ;;  %v1751_v6 = vld [vmem:[%s4057_s9 + $0x10] sm:$0xff]  ;;  %s3366_s9 = smov [#allocation4]  }
 0x2a9   :  { %v3748_v18 = vand.u32 4294901760, %v1751_v6  ;;  %v2322_v55 = vand.u32 4294901760, %v2321_v12  ;;  %s2874_s24 = sshll.u32 %s3366_s9, 4  ;;  %s2875_s24 = int_to_ptr.vmem [resolvable:$true] %s2874_s24 }
 0x2aa   :  { %v1286_v62 = vmul.f32 %v1278_v57, %v1254_v58  ;;  %v1287_v0 = vmul.f32 %v1279_v59, %v1255_v9  ;;  %v1288_v5 = vmul.f32 %v1280_v60, %v1256_v15  ;;  %v3738_v9 = vand.u32 4294901760, %v1752_v61  ;;  %s3299_s27 = scalar_lea.vmem %s2875_s24, 64  ;;  %p3304_p1 = scmp.lt.s32.totalorder %s2875_s24, %s2875_s24 }
 0x2ab   :  { %v3763_v27 = vsub.f32 %v1751_v6, %v3748_v18  ;;  %v2323_v57 = vsub.f32 %v2321_v12, %v2322_v55  ;;  %p3300_p0 = scmp.ne.s32.totalorder %s2875_s24, %s3299_s27  ;;  %p3305_p2 = scmp.lt.s32.totalorder %s3299_s27, %s3299_s27 }
 0x2ac   :  { %v1293_v10 = vrot.slane %v1286_v62, 7  ;;  %v1295_v11 = vrot.slane %v1287_v0, 6  ;;  %v1297_v1 = vrot.slane %v1288_v5, 5  ;;  %v3751_v21 = vsub.f32 %v1752_v61, %v3738_v9 }
 0x2ad   :  { %v3779_v34 = vand.u32 4294901760, %v3763_v27  ;;  %v2324_v59 = vand.u32 4294901760, %v2323_v57  ;;  %p3306_p3 = por %p3305_p2, %p3304_p1 }
 0x2ae   :  { %v1294_v56 = vsel %vm182_vm5, %v1293_v10, %v1285_v7  ;;  %v3766_v28 = vand.u32 4294901760, %v3751_v21 }
 0x2af   :  { %v1296_v14 = vsel %vm185_vm6, %v1295_v11, %v1294_v56  ;;  %v1877_v38 = vsub.f32 %v3763_v27, %v3779_v34  ;;  %p3307_p4 = pnand %p3306_p3, %p3300_p0 }
 0x2b0   :  { %v1298_v47 = vsel %vm188_vm7, %v1297_v1, %v1296_v14  ;;  %v1870_v37 = vsub.f32 %v3751_v21, %v3766_v28 }
 0x2b1   :  { %v1299_v52 = vsel %vm652_vm8, %v1298_v47, 0  ;;  %v3812_v44 = vand.u32 4294901760, %v1877_v38 }
 0x2b2   :  { %v1332_v3 = vand.u32 4294901760, %v1299_v52  ;;  %v3801_v41 = vand.u32 4294901760, %v1870_v37 }
 0x2b4   :  { %3122 = vmatpush3.xpose.msra.mxu0 %v1332_v3  ;;  %v1368_v58 = vsub.f32 %v1299_v52, %v1332_v3 }
 0x2b5   :  { %3131 = vmatprep.subr.mxu0 %v3364_v2 }
 0x2b6   :  { %v1369_v15 = vand.u32 4294901760, %v1368_v58 }
 0x2b8   :  { %v1370_v20 = vsub.f32 %v1368_v58, %v1369_v15 }
 0x2ba   :  { %v1371_v32 = vand.u32 4294901760, %v1370_v20 }
 0x2bc   :  { %3124 = vmatmul.mubr.f32.vlgmr.msra.gmra.mxu0 %v1371_v32  ;;  %3127 = vmatpush3.xpose.msra.mxu1 %v1371_v32 }
 0x2bd   :  { %3132 = vmatpush3.xpose.msra.mxu0 %v1368_v58  ;;  %3133 = vmatprep.mubr.msk.f32.mxu0 %vm3365_vm2, %v3364_v2 }
 0x2be   :  { %3136 = vmatprep.subr.mxu1 %v3364_v2  ;;  %3141 = vmatprep.subr.mxu0 %v3364_v2 }
 0x2bf   :  { %3129 = vmatmul.mubr.f32.vlgmr.msra.gmra.mxu1 %v1332_v3 }
 0x2c0   :  { %3134 = vmatmul.mubr.f32.vlgmr.msra.gmra.mxu0 %v1368_v58  ;;  %3137 = vmatpush3.xpose.msra.mxu1 %v1332_v3 }
 0x2c1   :  { %3142 = vmatpush3.xpose.msra.mxu0 %v1369_v15  ;;  %3138 = vmatprep.mubr.msk.f32.mxu1 %vm3365_vm2, %v3364_v2 }
 0x2c2   :  { %3143 = vmatprep.mubr.msk.f32.mxu0 %vm3365_vm2, %v3364_v2  ;;  %3146 = vmatprep.subr.mxu1 %v3364_v2 }
 0x2c3   :  { %3139 = vmatmul.mubr.f32.vlgmr.msra.gmra.mxu1 %v1369_v15  ;;  %3151 = vmatprep.subr.mxu0 %v3364_v2 }
 0x2c4   :  { %3144 = vmatmul.mubr.f32.vlgmr.msra.gmra.mxu0 %v1332_v3  ;;  %3147 = vmatpush3.xpose.msra.mxu1 %v1332_v3 }
 0x2c5   :  { %3152 = vmatpush3.msra.mxu0 %v3738_v9  ;;  %3148 = vmatprep.mubr.msk.f32.mxu1 %vm3365_vm2, %v3364_v2 }
 0x2c6   :  { %3153 = vmatprep.subr.mxu0 %v3364_v2  ;;  %3162 = vmatprep.subr.mxu1 %v3364_v2 }
 0x2c7   :  { %3154 = vmatpush3.msra.mxu0 %v3748_v18  ;;  %3149 = vmatmul.mubr.f32.vlgmr.msra.gmra.mxu1 %v1332_v3 }
 0x2c8   :  { %3155 = vmatprep.subr.mxu0 %v3364_v2  ;;  %3163 = vmatpush3.msra.mxu1 %v3801_v41 }
 0x2c9   :  { %3156 = vmatpush3.msra.mxu0 %v3756_v22  ;;  %3164 = vmatprep.subr.mxu1 %v3364_v2 }
 0x2ca   :  { %3157 = vmatprep.subr.mxu0 %v3364_v2  ;;  %3159 = vmatprep.mubr.msk.f32.mxu0 %vm3365_vm2, %v3364_v2 }
 0x2cb   :  { %3158 = vmatpush3.msra.mxu0 %v3760_v33  ;;  %3165 = vmatpush3.msra.mxu1 %v3812_v44 }
 0x2cc   :  { %3160 = vmatmul.mubr.f32.vlgmr.msra.gmra.mxu0 %v1836_v49  ;;  %3166 = vmatprep.subr.mxu1 %v3364_v2 }
 0x2cd   :  { %3173 = vmatprep.subr.mxu0 %v3364_v2  ;;  %3167 = vmatpush3.msra.mxu1 %v3820_v46 }
 0x2ce   :  { %3174 = vmatpush3.msra.mxu0 %v3751_v21  ;;  %3168 = vmatprep.subr.mxu1 %v3364_v2 }
 0x2cf   :  { %3175 = vmatprep.subr.mxu0 %v3364_v2  ;;  %3169 = vmatpush3.msra.mxu1 %v3827_v50 }
 0x2d0   :  { %3170 = vmatprep.mubr.msk.f32.mxu1 %vm3365_vm2, %v3364_v2  ;;  %3176 = vmatpush3.msra.mxu0 %v3763_v27 }
 0x2d1   :  { %3171 = vmatmul.mubr.f32.vlgmr.msra.gmra.mxu1 %v3758_v26  ;;  %3177 = vmatprep.subr.mxu0 %v3364_v2 }
 0x2d2   :  { %3184 = vmatprep.subr.mxu1 %v3364_v2  ;;  %3178 = vmatpush3.msra.mxu0 %v3771_v30 }
 0x2d3   :  { %3185 = vmatpush3.msra.mxu1 %v3738_v9  ;;  %3179 = vmatprep.subr.mxu0 %v3364_v2 }
 0x2d4   :  { %3186 = vmatprep.subr.mxu1 %v3364_v2  ;;  %3180 = vmatpush3.msra.mxu0 %v3782_v36 }
 0x2d5   :  { %3181 = vmatprep.mubr.msk.f32.mxu0 %vm3365_vm2, %v3364_v2  ;;  %3187 = vmatpush3.msra.mxu1 %v3748_v18 }
 0x2d6   :  { %3182 = vmatmul.mubr.f32.vlgmr.msra.gmra.mxu0 %v3774_v23  ;;  %3188 = vmatprep.subr.mxu1 %v3364_v2 }
 0x2d7   :  { %3195 = vmatprep.subr.mxu0 %v3364_v2  ;;  %3189 = vmatpush3.msra.mxu1 %v3756_v22 }
 0x2d8   :  { %3196 = vmatpush3.msra.mxu0 %v3766_v28  ;;  %3190 = vmatprep.subr.mxu1 %v3364_v2 }
 0x2d9   :  { %3197 = vmatprep.subr.mxu0 %v3364_v2  ;;  %3191 = vmatpush3.msra.mxu1 %v3760_v33 }
 0x2da   :  { %3192 = vmatprep.mubr.msk.f32.mxu1 %vm3365_vm2, %v3364_v2  ;;  %3198 = vmatpush3.msra.mxu0 %v3779_v34 }
 0x2db   :  { %3193 = vmatmul.mubr.f32.vlgmr.msra.gmra.mxu1 %v1834_v25  ;;  %3199 = vmatprep.subr.mxu0 %v3364_v2 }
 0x2dc   :  { %3206 = vmatprep.subr.mxu1 %v3364_v2  ;;  %3200 = vmatpush3.msra.mxu0 %v3789_v24 }
 0x2dd   :  { %3207 = vmatpush3.msra.mxu1 %v3738_v9  ;;  %3201 = vmatprep.subr.mxu0 %v3364_v2 }
 0x2de   :  { %3208 = vmatprep.subr.mxu1 %v3364_v2  ;;  %3202 = vmatpush3.msra.mxu0 %v3799_v39 }
 0x2df   :  { %3203 = vmatprep.mubr.msk.f32.mxu0 %vm3365_vm2, %v3364_v2  ;;  %3209 = vmatpush3.msra.mxu1 %v3748_v18 }
 0x2e0   :  { %3204 = vmatmul.mubr.f32.vlgmr.msra.gmra.mxu0 %v3758_v26  ;;  %3210 = vmatprep.subr.mxu1 %v3364_v2 }
 0x2e1   :  { %3217 = vmatprep.subr.mxu0 %v3364_v2  ;;  %3211 = vmatpush3.msra.mxu1 %v3756_v22 }
 0x2e2   :  { %3218 = vmatpush3.msra.mxu0 %v3738_v9  ;;  %3212 = vmatprep.subr.mxu1 %v3364_v2 }
 0x2e3   :  { %3219 = vmatprep.subr.mxu0 %v3364_v2  ;;  %3213 = vmatpush3.msra.mxu1 %v3760_v33 }
 0x2e4   :  { %3214 = vmatprep.mubr.msk.f32.mxu1 %vm3365_vm2, %v3364_v2  ;;  %3220 = vmatpush3.msra.mxu0 %v3748_v18 }
 0x2e5   :  { %3215 = vmatmul.mubr.f32.vlgmr.msra.gmra.mxu1 %v3758_v26  ;;  %3221 = vmatprep.subr.mxu0 %v3364_v2 }
 0x2e6   :  { %3228 = vmatprep.subr.mxu1 %v3364_v2  ;;  %3222 = vmatpush3.msra.mxu0 %v3756_v22 }
 0x2e7   :  { %3229 = vmatpush3.msra.mxu1 %v3801_v41  ;;  %3223 = vmatprep.subr.mxu0 %v3364_v2 }
 0x2e8   :  { %3230 = vmatprep.subr.mxu1 %v3364_v2  ;;  %3224 = vmatpush3.msra.mxu0 %v3760_v33 }
 0x2e9   :  { %3225 = vmatprep.mubr.msk.f32.mxu0 %vm3365_vm2, %v3364_v2  ;;  %3231 = vmatpush3.msra.mxu1 %v3812_v44 }
 0x2ea   :  { %3226 = vmatmul.mubr.f32.vlgmr.msra.gmra.mxu0 %v2324_v59  ;;  %3232 = vmatprep.subr.mxu1 %v3364_v2 }
 0x2eb   :  { %3239 = vmatprep.subr.mxu0 %v3364_v2  ;;  %3233 = vmatpush3.msra.mxu1 %v3820_v46 }
 0x2ec   :  { %3240 = vmatpush3.msra.mxu0 %v3751_v21  ;;  %3234 = vmatprep.subr.mxu1 %v3364_v2 }
 0x2ed   :  { %3241 = vmatprep.subr.mxu0 %v3364_v2  ;;  %3235 = vmatpush3.msra.mxu1 %v3827_v50 }
 0x2ee   :  { %3236 = vmatprep.mubr.msk.f32.mxu1 %vm3365_vm2, %v3364_v2  ;;  %3242 = vmatpush3.msra.mxu0 %v3763_v27 }
 0x2ef   :  { %3237 = vmatmul.mubr.f32.vlgmr.msra.gmra.mxu1 %v3856_v54  ;;  %3243 = vmatprep.subr.mxu0 %v3364_v2 }
 0x2f0   :  { %3250 = vmatprep.subr.mxu1 %v3364_v2  ;;  %3244 = vmatpush3.msra.mxu0 %v3771_v30 }
 0x2f1   :  { %3251 = vmatpush3.msra.mxu1 %v3738_v9  ;;  %3245 = vmatprep.subr.mxu0 %v3364_v2 }
 0x2f2   :  { %3252 = vmatprep.subr.mxu1 %v3364_v2  ;;  %3246 = vmatpush3.msra.mxu0 %v3782_v36 }
 0x2f3   :  { %3247 = vmatprep.mubr.msk.f32.mxu0 %vm3365_vm2, %v3364_v2  ;;  %3253 = vmatpush3.msra.mxu1 %v3748_v18 }
 0x2f4   :  { %3248 = vmatmul.mubr.f32.vlgmr.msra.gmra.mxu0 %v2321_v12  ;;  %3254 = vmatprep.subr.mxu1 %v3364_v2 }
 0x2f5   :  { %3261 = vmatprep.subr.mxu0 %v3364_v2  ;;  %3255 = vmatpush3.msra.mxu1 %v3756_v22 }
 0x2f6   :  { %3262 = vmatpush3.msra.mxu0 %v3766_v28  ;;  %3256 = vmatprep.subr.mxu1 %v3364_v2 }
 0x2f7   :  { %3263 = vmatprep.subr.mxu0 %v3364_v2  ;;  %3257 = vmatpush3.msra.mxu1 %v3760_v33 }
 0x2f8   :  { %3258 = vmatprep.mubr.msk.f32.mxu1 %vm3365_vm2, %v3364_v2  ;;  %3264 = vmatpush3.msra.mxu0 %v3779_v34 }
 0x2f9   :  { %3259 = vmatmul.mubr.f32.vlgmr.msra.gmra.mxu1 %v2322_v55  ;;  %3265 = vmatprep.subr.mxu0 %v3364_v2 }
 0x2fa   :  { %3272 = vmatprep.subr.mxu1 %v3364_v2  ;;  %3266 = vmatpush3.msra.mxu0 %v3789_v24 }
 0x2fb   :  { %3273 = vmatpush3.msra.mxu1 %v3738_v9  ;;  %3267 = vmatprep.subr.mxu0 %v3364_v2 }
 0x2fc   :  { %3274 = vmatprep.subr.mxu1 %v3364_v2  ;;  %3268 = vmatpush3.msra.mxu0 %v3799_v39 }
 0x2fd   :  { %3269 = vmatprep.mubr.msk.f32.mxu0 %vm3365_vm2, %v3364_v2  ;;  %3275 = vmatpush3.msra.mxu1 %v3748_v18 }
 0x2fe   :  { %3270 = vmatmul.mubr.f32.vlgmr.msra.gmra.mxu0 %v3856_v54  ;;  %3276 = vmatprep.subr.mxu1 %v3364_v2 }
 0x2ff   :  { %3277 = vmatpush3.msra.mxu1 %v3756_v22  ;;  %3280 = vmatprep.mubr.msk.f32.mxu1 %vm3365_vm2, %v3364_v2 }
 0x300   :  { %3278 = vmatprep.subr.mxu1 %v3364_v2 }
 0x301   :  { %3279 = vmatpush3.msra.mxu1 %v3760_v33 }
 0x302   :  { %3281 = vmatmul.mubr.f32.vlgmr.msra.gmra.mxu1 %v3856_v54 }
 0x303   :  { %3310 = shalt.err (!%p3307_p4)
}
 0x304   :  { %2877 = dma.vmem_to_hbm [thread:$0]  %s2875_s24, 64, %s4060_s12, [#allocation5]  }
 0x305   :  { %s3319_s28 = scalar_lea.vmem %s2865_s26, 64  ;;  %p3324_p6 = scmp.lt.s32.totalorder %s2865_s26, %s2865_s26 }
 0x306   :  { %p3320_p5 = scmp.ne.s32.totalorder %s2865_s26, %s3319_s28  ;;  %p3325_p7 = scmp.lt.s32.totalorder %s3319_s28, %s3319_s28 }
 0x308   :  { %p3326_p8 = por %p3325_p7, %p3324_p6 }
 0x30a   :  { %p3327_p9 = pnand %p3326_p8, %p3320_p5 }
 0x30c   :  { %3330 = shalt.err (!%p3327_p9)
}
 0x30d   :  { %2867 = dma.vmem_to_hbm [thread:$0]  %s2865_s26, 64, %s4059_s11, [#allocation3]   ;;  %vm1747_vm10 = vcmask 27648  }
 0x30e   :  { %s3368_s12 = smov [#allocation6]  }
 0x30f   :  { %s2884_s16 = sshll.u32 %s3368_s12, 4  ;;  %s2885_s16 = int_to_ptr.vmem [resolvable:$true] %s2884_s16 }
 0x310   :  { %s3339_s11 = scalar_lea.vmem %s2885_s16, 64  ;;  %p3344_p11 = scmp.lt.s32.totalorder %s2885_s16, %s2885_s16 }
 0x311   :  { %p3340_p10 = scmp.ne.s32.totalorder %s2885_s16, %s3339_s11  ;;  %p3345_p12 = scmp.lt.s32.totalorder %s3339_s11, %s3339_s11 }
 0x313   :  { %p3346_p13 = por %p3345_p12, %p3344_p11 }
 0x315   :  { %p3347_p0 = pnand %p3346_p13, %p3340_p10 }
 0x37c   :  { %v1373_v2 = vpop.f32.mrf.mxu0 }
 0x37e   :  { %v3125_v60 = vpop.f32.mrf.mxu0 }
 0x37f   :  { %v1449_v62 = vpop.f32.mrf.mxu1 }
 0x380   :  { %v1450_v0 = vadd.f32 %v1449_v62, %v1373_v2  ;;  %v1523_v5 = vpop.f32.mrf.mxu0 }
 0x381   :  { %v3130_v7 = vpop.f32.mrf.mxu1 }
 0x382   :  { %v1524_v10 = vadd.f32 %v1523_v5, %v1450_v0  ;;  %v3135_v11 = vpop.f32.mrf.mxu0 }
 0x383   :  { %v1597_v56 = vpop.f32.mrf.mxu1 }
 0x384   :  { %v1598_v1 = vadd.f32 %v1597_v56, %v1524_v10  ;;  %v1671_v14 = vpop.f32.mrf.mxu0 }
 0x385   :  { %v3140_v47 = vpop.f32.mrf.mxu1 }
 0x386   :  { %v1672_v52 = vadd.f32 %v1671_v14, %v1598_v1  ;;  %v3145_v61 = vpop.f32.mrf.mxu0 }
 0x387   :  { %v1743_v3 = vpop.f32.mrf.mxu1 }
 0x388   :  { %v1744_v58 = vadd.f32 %v1743_v3, %v1672_v52 }
 0x389   :  { %v3150_v9 = vpop.f32.mrf.mxu1 }
 0x38a   :  { %1748 = vst.msk [vmem:[#allocation6] sm:$0xf] %vm1747_vm10, %v1744_v58 }
 0x38b   :  { %3350 = shalt.err (!%p3347_p0)
}
 0x38c   :  { %2887 = dma.vmem_to_hbm [thread:$0]  %s2885_s16, 64, %s4061_s13, [#allocation5]   ;;  %v1838_v6 = vpop.f32.mrf.mxu0  ;;  %v2910_v21 = vld [vmem:[%s4058_s10] ss:$0 sm:$0xff]  ;;  %v3369_v22 = vmov 1966171168  }
 0x38d   :  { %v2738_v26 = vunpack.c.l.s4 %v3369_v22  ;;  %v1839_v32 = vadd.f32 %v2910_v21, %v1838_v6 }
 0x38e   :  { %v3161_v15 = vpop.f32.mrf.mxu0 }
 0x38f   :  { %v2739_v28 = vunpack.c.0.s8 %v2738_v26 }
 0x391   :  { %v1929_v16 = vpop.f32.mrf.mxu1  ;;  %v2742_v37 = vsub.s32 %v2739_v28, %v3455_v4 }
 0x392   :  { %v1930_v27 = vadd.f32 %v1929_v16, %v1839_v32 }
 0x393   :  { %v3172_v17 = vpop.f32.mrf.mxu1 }
 0x396   :  { %v2009_v18 = vpop.f32.mrf.mxu0 }
 0x397   :  { %v2010_v30 = vadd.f32 %v2009_v18, %v1930_v27 }
 0x398   :  { %v3183_v20 = vpop.f32.mrf.mxu0 }
 0x39b   :  { %v2086_v19 = vpop.f32.mrf.mxu1 }
 0x39c   :  { %v2087_v34 = vadd.f32 %v2086_v19, %v2010_v30 }
 0x39d   :  { %v3194_v33 = vpop.f32.mrf.mxu1 }
 0x3a0   :  { %v2169_v23 = vpop.f32.mrf.mxu0 }
 0x3a1   :  { %v2170_v24 = vadd.f32 %v2169_v23, %v2087_v34 }
 0x3a2   :  { %v3205_v36 = vpop.f32.mrf.mxu0 }
 0x3a5   :  { %v2244_v25 = vpop.f32.mrf.mxu1 }
 0x3a6   :  { %v2245_v38 = vadd.f32 %v2244_v25, %v2170_v24 }
 0x3a7   :  { %v3216_v39 = vpop.f32.mrf.mxu1 }
 0x3a8   :  { %v2743_v41 = vrot.slane %v2245_v38, %v2742_v37 }
 0x3aa   :  { %v2744_v42 = vcombine.high %v2743_v41, %v2743_v41  ;;  %v2751_v43 = vrot.slane %v2743_v41, %v2742_v37  ;;  %v2326_v44 = vpop.f32.mrf.mxu0 }
 0x3ab   :  { %v2327_v1 = vadd.f32 %v2910_v21, %v2326_v44 }
 0x3ac   :  { %v2758_v45 = vrot.slane %v2744_v42, %v2742_v37  ;;  %v2759_v46 = vcombine.high %v2751_v43, %v2751_v43  ;;  %v2764_v49 = vrot.slane %v2751_v43, %v3461_v13  ;;  %v3227_v50 = vpop.f32.mrf.mxu0 }
 0x3ae   :  { %v2760_v51 = vcombine.high %v2758_v45, %v2758_v45  ;;  %v2768_v54 = vrot.slane %v2758_v45, %v3461_v13  ;;  %v2772_v12 = vrot.slane %v2759_v46, %v3461_v13  ;;  %v2781_v4 = vmul.f32 %v2764_v49, %v3519_v48 }
 0x3af   :  { %v2782_v55 = vmul.f32 %v2764_v49, %v3525_v53  ;;  %v2417_v57 = vpop.f32.mrf.mxu1 }
 0x3b0   :  { %v2776_v59 = vrot.slane %v2760_v51, %v3461_v13  ;;  %v2783_v2 = vmul.f32 %v2768_v54, %v3488_v29  ;;  %v2784_v60 = vmul.f32 %v2768_v54, %v3493_v31  ;;  %v2785_v62 = vmul.f32 %v2772_v12, %v3502_v35  ;;  %2789 = vst.msk [vmem:[%s4062_s14] sm:$0xff] %vm114_vm4, %v2781_v4 }
 0x3b1   :  { %v2786_v0 = vmul.f32 %v2772_v12, %v3510_v40  ;;  %2790 = vst.msk [vmem:[%s4062_s14 + $0x8] sm:$0xff] %vm114_vm4, %v2782_v55  ;;  %v3238_v5 = vpop.f32.mrf.mxu1  ;;  %v2418_v47 = vadd.f32 %v2417_v57, %v2327_v1 }
 0x3b2   :  { %v2787_v7 = vmul.f32 %v2776_v59, %v3533_v63  ;;  %v2788_v10 = vmul.f32 %v2776_v59, %v3539_v8  ;;  %2791 = vst.msk [vmem:[%s4062_s14 + $0x10] sm:$0xff] %vm114_vm4, %v2783_v2  ;;  %2792 = vst.msk [vmem:[%s4062_s14 + $0x18] sm:$0xff] %vm114_vm4, %v2784_v60 }
 0x3b3   :  { %2793 = vst.msk [vmem:[%s4062_s14 + $0x20] sm:$0xff] %vm114_vm4, %v2785_v62  ;;  %2794 = vst.msk [vmem:[%s4062_s14 + $0x28] sm:$0xff] %vm114_vm4, %v2786_v0 }
 0x3b4   :  { %2795 = vst.msk [vmem:[%s4062_s14 + $0x30] sm:$0xff] %vm114_vm4, %v2787_v7  ;;  %2796 = vst.msk [vmem:[%s4062_s14 + $0x38] sm:$0xff] %vm114_vm4, %v2788_v10  ;;  %v2497_v11 = vpop.f32.mrf.mxu0 }
 0x3b5   :  { %v2498_v61 = vadd.f32 %v2497_v11, %v2418_v47 }
 0x3b6   :  { %v3249_v56 = vpop.f32.mrf.mxu0 }
 0x3b9   :  { %v2574_v14 = vpop.f32.mrf.mxu1 }
 0x3ba   :  { %v2575_v58 = vadd.f32 %v2574_v14, %v2498_v61 }
 0x3bb   :  { %v3260_v52 = vpop.f32.mrf.mxu1 }
 0x3be   :  { %v2657_v3 = vpop.f32.mrf.mxu0 }
 0x3bf   :  { %v2658_v6 = vadd.f32 %v2657_v3, %v2575_v58 }
 0x3c0   :  { %v3271_v9 = vpop.f32.mrf.mxu0 }
 0x3c2   :  { %v2732_v15 = vpop.f32.mrf.mxu1 }
 0x3c3   :  { %v2733_v16 = vadd.f32 %v2732_v15, %v2658_v6 }
 0x3c4   :  { %v3282_v17 = vpop.f32.mrf.mxu1 }
 0x3c5   :  { %v2804_v18 = vrot.slane %v2733_v16, %v2742_v37 }
 0x3c7   :  { %v2805_v20 = vcombine.high %v2804_v18, %v2804_v18  ;;  %v2812_v19 = vrot.slane %v2804_v18, %v2742_v37 }
 0x3c9   :  { %v2819_v22 = vrot.slane %v2805_v20, %v2742_v37  ;;  %v2820_v26 = vcombine.high %v2812_v19, %v2812_v19  ;;  %v2825_v32 = vrot.slane %v2812_v19, %v3461_v13 }
 0x3cb   :  { %v2821_v33 = vcombine.high %v2819_v22, %v2819_v22  ;;  %v2829_v21 = vrot.slane %v2819_v22, %v3461_v13  ;;  %v2833_v27 = vrot.slane %v2820_v26, %v3461_v13  ;;  %v2842_v28 = vmul.f32 %v2825_v32, %v3519_v48 }
 0x3cc   :  { %v2843_v30 = vmul.f32 %v2825_v32, %v3525_v53 }
 0x3cd   :  { %v2837_v23 = vrot.slane %v2821_v33, %v3461_v13  ;;  %v2844_v34 = vmul.f32 %v2829_v21, %v3488_v29  ;;  %v2845_v36 = vmul.f32 %v2829_v21, %v3493_v31  ;;  %v2846_v37 = vmul.f32 %v2833_v27, %v3502_v35  ;;  %2850 = vst.msk [vmem:[%s4063_s15] sm:$0xff] %vm114_vm4, %v2842_v28 }
 0x3ce   :  { %v2847_v24 = vmul.f32 %v2833_v27, %v3510_v40  ;;  %2851 = vst.msk [vmem:[%s4063_s15 + $0x8] sm:$0xff] %vm114_vm4, %v2843_v30 }
 0x3cf   :  { %v2848_v13 = vmul.f32 %v2837_v23, %v3533_v63  ;;  %v2849_v29 = vmul.f32 %v2837_v23, %v3539_v8  ;;  %2852 = vst.msk [vmem:[%s4063_s15 + $0x10] sm:$0xff] %vm114_vm4, %v2844_v34  ;;  %2853 = vst.msk [vmem:[%s4063_s15 + $0x18] sm:$0xff] %vm114_vm4, %v2845_v36 }
 0x3d0   :  { %2854 = vst.msk [vmem:[%s4063_s15 + $0x20] sm:$0xff] %vm114_vm4, %v2846_v37  ;;  %2855 = vst.msk [vmem:[%s4063_s15 + $0x28] sm:$0xff] %vm114_vm4, %v2847_v24 }
 0x3d1   :  { %2856 = vst.msk [vmem:[%s4063_s15 + $0x30] sm:$0xff] %vm114_vm4, %v2848_v13  ;;  %2857 = vst.msk [vmem:[%s4063_s15 + $0x38] sm:$0xff] %vm114_vm4, %v2849_v29 }
 0x3d2   :  { %3359 = dma.done.wait [#allocation3], 64  }
 0x3d3   :  { %3360 = vsyncadd [#allocation3], 4294967232 }
 0x3d4   :  { %3361 = dma.done.wait [#allocation5], 128  }
 0x3d5   :  { %3362 = vsyncadd [#allocation5], 4294967168 }
 0x3d6   :  { %2905 = vsyncpa [#allocation3], 1 }
 0x3d7   :  { %2906 = vsyncpa [#allocation5], 1 }

</bundles_post_ra>
